<compile_context>
chip_gen: v7x
topology: tpu7x:2x2x1
jax: 0.10.0
libtpu: 0.0.40
codegen_flags: <defaults>
</compile_context>

<pallas_src>
import jax
import jax.numpy as jnp
from jax import lax
from jax.experimental import pallas as pl
from jax.experimental.pallas import tpu as pltpu


_LANE = 128
_VMEM = pl.BlockSpec(memory_space=pltpu.MemorySpace.VMEM)


def _round_up(v, m):
    return ((v + m - 1) // m) * m


def _apply_act(y, activation):
    if activation == "relu":
        return jnp.maximum(y, 0.0)
    if activation == "sigmoid":
        return jax.nn.sigmoid(y)
    if activation == "tanh":
        return jnp.tanh(y)
    if activation == "leakyrelu":
        # nn.LeakyReLU(0.2) in the reference module.
        return jnp.where(y >= 0.0, y, 0.2 * y)
    if activation == "none":
        return y
    raise ValueError("Unknown activation type %s" % activation)


# ----------------------------------------------------------------------------
# Fused kernel
# ----------------------------------------------------------------------------
def _make_fused_kernel(enc_meta, fe_meta, dec_meta, latent_dim):
    """kernel(x_ref, y_ref, w_ref, rows_ref, xhat_ref, latent_ref).

    w_ref:    (L, P, P) bf16 -- all padded weights stacked.
    rows_ref: (R, P)   f32  -- all bias / gamma / beta rows stacked.
    """

    def run_layer(h, meta, w_ref, rows_ref):
        if h.dtype != jnp.bfloat16:
            h = h.astype(jnp.bfloat16)
        w = w_ref[meta["w_idx"]]                      # static slice, (P, P) bf16
        y = jnp.dot(h, w, preferred_element_type=jnp.float32)
        if meta["use_bn"]:
            # Linear bias cancels exactly under training-mode BN -> no bias here.
            g_row = meta["gamma_row"]
            b_row = meta["beta_row"]
            gamma = rows_ref[g_row:g_row + 1, :]
            beta = rows_ref[b_row:b_row + 1, :]
            # Two-pass batch stats (numerically safe), biased variance, eps=1e-5.
            mean = jnp.mean(y, axis=0, keepdims=True)
            yc = y - mean
            var = jnp.mean(yc * yc, axis=0, keepdims=True)
            scale = gamma * lax.rsqrt(var + 1e-5)
            y = yc * scale + beta
        else:
            b_row = meta["bias_row"]
            y = y + rows_ref[b_row:b_row + 1, :]
        return _apply_act(y, meta["act"])

    def kernel(x_ref, y_ref, w_ref, rows_ref, xhat_ref, latent_ref):
        # Encoder branch (x).
        h = x_ref[...]
        for meta in enc_meta:
            h = run_layer(h, meta, w_ref, rows_ref)

        # spectral_fe branch (y).
        g = y_ref[...]
        for meta in fe_meta:
            g = run_layer(g, meta, w_ref, rows_ref)

        # latent = softmax(h * g, dim=1) over the real latent lanes only;
        # lanes >= latent_dim are padding and must not enter the denominator.
        z = h * g
        lane = lax.broadcasted_iota(jnp.int32, z.shape, 1)
        z = jnp.where(lane < latent_dim, z, -1e30)
        m = jnp.max(z, axis=1, keepdims=True)
        e = jnp.exp(z - m)
        denom = jnp.sum(e, axis=1, keepdims=True)
        lat = e * pl.reciprocal(denom, approx=True)
        latent_ref[...] = lat.astype(latent_ref.dtype)

        # Decoder.
        h = lat
        for meta in dec_meta:
            h = run_layer(h, meta, w_ref, rows_ref)
        xhat_ref[...] = h.astype(xhat_ref.dtype)

    return kernel


# ----------------------------------------------------------------------------
# Parameter init (mirrors nn.Linear default: U(-1/sqrt(in), 1/sqrt(in)))
# ----------------------------------------------------------------------------
def _init_linear_padded(key, in_dim, out_dim, pad_dim):
    kw, kb = jax.random.split(key)
    bound = 1.0 / float(in_dim) ** 0.5
    w = jax.random.uniform(kw, (in_dim, out_dim), jnp.float32, -bound, bound)
    b = jax.random.uniform(kb, (out_dim,), jnp.float32, -bound, bound)
    w_pad = jnp.zeros((pad_dim, pad_dim), jnp.float32).at[:in_dim, :out_dim].set(w)
    b_pad = jnp.zeros((pad_dim,), jnp.float32).at[:out_dim].set(b)
    return w_pad, b_pad


class AutoencoderPallas:
    def __init__(self, encoder_dim, attation_dim_ht, attation_dim_center,
                 activation="relu", batchnorm=True, key=None):
        self._dim = len(encoder_dim) - 1
        self._feat_dim = encoder_dim[0]
        self._latent_dim = encoder_dim[-1]

        fe_dims = ([attation_dim_ht[0]] + list(attation_dim_center)
                   + [attation_dim_ht[-1]])
        all_dims = list(encoder_dim) + fe_dims
        self._pad = max(_round_up(int(d), _LANE) for d in all_dims)
        P = self._pad

        keys = iter(jax.random.split(key, 64))

        weights = []   # padded (P, P) f32 slabs, stacked + cast to bf16 below
        rows = []      # padded (P,) f32 rows: bias (non-BN) / gamma,beta (BN)
        enc_meta, fe_meta, dec_meta = [], [], []

        def add_layer(meta_list, in_dim, out_dim, use_bn, act):
            w, b = _init_linear_padded(next(keys), in_dim, out_dim, P)
            meta = dict(use_bn=use_bn, act=act, w_idx=len(weights))
            weights.append(w)
            if use_bn:
                # Bias is not materialized: it cancels under training-mode BN.
                gamma = jnp.zeros((P,), jnp.float32).at[:out_dim].set(1.0)
                beta = jnp.zeros((P,), jnp.float32)
                meta["gamma_row"] = len(rows); rows.append(gamma)
                meta["beta_row"] = len(rows); rows.append(beta)
            else:
                meta["bias_row"] = len(rows); rows.append(b)
            meta_list.append(meta)

        # Encoder: Linear, then (BN + act) for all but the last layer.
        for i in range(self._dim):
            last = (i == self._dim - 1)
            add_layer(enc_meta, encoder_dim[i], encoder_dim[i + 1],
                      use_bn=(batchnorm and not last),
                      act=("none" if last else activation))

        # spectral_fe: Linear stack, ReLU between, Sigmoid at the end, no BN.
        n_fe = len(fe_dims) - 1
        for i in range(n_fe):
            add_layer(fe_meta, fe_dims[i], fe_dims[i + 1], use_bn=False,
                      act=("sigmoid" if i == n_fe - 1 else "relu"))

        # Decoder: Linear + BN + activation after EVERY layer.
        decoder_dim = list(reversed(encoder_dim))
        for i in range(self._dim):
            add_layer(dec_meta, decoder_dim[i], decoder_dim[i + 1],
                      use_bn=batchnorm, act=activation)

        # Single bf16 weight slab + single f32 row slab (one DMA each).
        self._w_all = jnp.stack(weights, axis=0).astype(jnp.bfloat16)  # (L,P,P)
        self._rows = jnp.stack(rows, axis=0)                           # (R,P)

        self._kernel = _make_fused_kernel(enc_meta, fe_meta, dec_meta,
                                          self._latent_dim)

    # Fully fused forward: one pallas_call for the whole network.
    def forward(self, x, y):
        n = x.shape[0]
        P = self._pad
        # Lane-dense bf16 inputs: zero-pad the feature dim to the 128-lane width.
        x_p = jnp.pad(x.astype(jnp.bfloat16), ((0, 0), (0, P - x.shape[1])))
        y_p = jnp.pad(y.astype(jnp.bfloat16), ((0, 0), (0, P - y.shape[1])))

        w_bytes = self._w_all.size * 2
        row_bytes = self._rows.size * 4
        io_bytes = (x_p.size + y_p.size) * 2 + 2 * n * P * 4
        vmem_limit = int(min(100 * 1024 * 1024,
                             4 * (w_bytes + row_bytes + io_bytes) + (4 << 20)))

        x_hat_p, latent_p = pl.pallas_call(
            self._kernel,
            out_shape=(jax.ShapeDtypeStruct((n, P), jnp.float32),
                       jax.ShapeDtypeStruct((n, P), jnp.float32)),
            in_specs=[_VMEM, _VMEM, _VMEM, _VMEM],
            out_specs=(_VMEM, _VMEM),
            compiler_params=pltpu.CompilerParams(vmem_limit_bytes=vmem_limit),
        )(x_p, y_p, self._w_all, self._rows)
        # Slice padded lanes away in the wrapper (kernel stores stay lane-dense).
        return x_hat_p[:, :self._feat_dim], latent_p[:, :self._latent_dim]

    # Convenience accessors matching the reference module's split.
    def encoder(self, x, y):
        _, latent = self.forward(x, y)
        return latent

    def decoder_from_latent(self, x, y):
        x_hat, _ = self.forward(x, y)
        return x_hat


# ----------------------------------------------------------------------------
# Demo
# ----------------------------------------------------------------------------
if __name__ == "__main__":
    encoder_dim = [32, 64, 16]           # feat_dim=32 -> hidden=64 -> latent=16
    attation_dim_ht = [32, 16]           # y feat dim 32, output = latent dim 16
    attation_dim_center = [64, 48, 32, 24]

    key = jax.random.PRNGKey(0)
    k_model, k_x, k_y = jax.random.split(key, 3)

    model = AutoencoderPallas(encoder_dim, attation_dim_ht, attation_dim_center,
                              activation="relu", batchnorm=True, key=k_model)

    N = 64  # multiple of 8 sublanes; whole batch fits one VMEM block
    x = jax.random.normal(k_x, (N, encoder_dim[0]), jnp.float32)
    y = jax.random.normal(k_y, (N, attation_dim_ht[0]), jnp.float32)

    x_hat, latent = model.forward(x, y)
    jax.block_until_ready((x_hat, latent))

    assert x_hat.shape == (N, encoder_dim[0])
    assert latent.shape == (N, encoder_dim[-1])
    assert bool(jnp.all(jnp.isfinite(x_hat))) and bool(jnp.all(jnp.isfinite(latent)))
    # softmax rows sum to ~1 (approx-reciprocal tolerance)
    assert bool(jnp.allclose(jnp.sum(latent, axis=1), 1.0, atol=1e-2))
    print("KERNEL_OK")
</pallas_src>

<mosaic_0001>
module attributes {stable_mosaic.version = 11 : i64} {
  func.func @kernel(%arg0: memref<64x128xbf16, #tpu.memory_space<vmem>>, %arg1: memref<64x128xbf16, #tpu.memory_space<vmem>>, %arg2: memref<9x128x128xbf16, #tpu.memory_space<vmem>>, %arg3: memref<12x128xf32, #tpu.memory_space<vmem>>, %arg4: memref<64x128xf32, #tpu.memory_space<vmem>>, %arg5: memref<64x128xf32, #tpu.memory_space<vmem>>) attributes {dimension_semantics = [], scalar_prefetch = 0 : i64, scratch_operands = 0 : i64, tpu.core_type = #tpu.core_type<tc>} {
    %c0 = arith.constant 0 : index
    %c0_0 = arith.constant 0 : index
    %0 = vector.load %arg0[%c0, %c0_0] : memref<64x128xbf16, #tpu.memory_space<vmem>>, vector<64x128xbf16>
    %c0_1 = arith.constant 0 : index
    %c0_2 = arith.constant 0 : index
    %c0_3 = arith.constant 0 : index
    %1 = vector.load %arg2[%c0_1, %c0_2, %c0_3] : memref<9x128x128xbf16, #tpu.memory_space<vmem>>, vector<1x128x128xbf16>
    %2 = vector.shape_cast %1 : vector<1x128x128xbf16> to vector<128x128xbf16>
    %cst = arith.constant dense<0.000000e+00> : vector<64x128xf32>
    %3 = tpu.matmul %0, %2, %cst {dimension_numbers = #tpu.dot_dimension_numbers<[1], [0], [0], [1], [0, 0, 1, 1], [], []>} : vector<64x128xbf16>, vector<128x128xbf16>, vector<64x128xf32> -> vector<64x128xf32>
    %c0_4 = arith.constant 0 : index
    %c0_5 = arith.constant 0 : index
    %4 = vector.load %arg3[%c0_4, %c0_5] : memref<12x128xf32, #tpu.memory_space<vmem>>, vector<1x128xf32>
    %c1 = arith.constant 1 : index
    %c0_6 = arith.constant 0 : index
    %5 = vector.load %arg3[%c1, %c0_6] : memref<12x128xf32, #tpu.memory_space<vmem>>, vector<1x128xf32>
    %cst_7 = arith.constant dense<0.000000e+00> : vector<128xf32>
    %6 = vector.multi_reduction <add>, %3, %cst_7 [0] : vector<64x128xf32> to vector<128xf32>
    %7 = vector.shape_cast %6 : vector<128xf32> to vector<1x128xf32>
    %cst_8 = arith.constant 6.400000e+01 : f32
    %8 = vector.broadcast %cst_8 : f32 to vector<1x128xf32>
    %9 = arith.divf %7, %8 : vector<1x128xf32>
    %10 = vector.broadcast %9 : vector<1x128xf32> to vector<64x128xf32>
    %11 = arith.subf %3, %10 : vector<64x128xf32>
    %12 = arith.mulf %11, %11 : vector<64x128xf32>
    %cst_9 = arith.constant dense<0.000000e+00> : vector<128xf32>
    %13 = vector.multi_reduction <add>, %12, %cst_9 [0] : vector<64x128xf32> to vector<128xf32>
    %14 = vector.shape_cast %13 : vector<128xf32> to vector<1x128xf32>
    %cst_10 = arith.constant 6.400000e+01 : f32
    %15 = vector.broadcast %cst_10 : f32 to vector<1x128xf32>
    %16 = arith.divf %14, %15 : vector<1x128xf32>
    %cst_11 = arith.constant 9.99999974E-6 : f32
    %17 = vector.broadcast %cst_11 : f32 to vector<1x128xf32>
    %18 = arith.addf %16, %17 : vector<1x128xf32>
    %19 = math.rsqrt %18 : vector<1x128xf32>
    %20 = arith.mulf %4, %19 : vector<1x128xf32>
    %21 = vector.broadcast %20 : vector<1x128xf32> to vector<64x128xf32>
    %22 = arith.mulf %11, %21 : vector<64x128xf32>
    %23 = vector.broadcast %5 : vector<1x128xf32> to vector<64x128xf32>
    %24 = arith.addf %22, %23 : vector<64x128xf32>
    %cst_12 = arith.constant 0.000000e+00 : f32
    %25 = vector.broadcast %cst_12 : f32 to vector<64x128xf32>
    %26 = arith.maximumf %24, %25 : vector<64x128xf32>
    %27 = arith.truncf %26 : vector<64x128xf32> to vector<64x128xbf16>
    %c1_13 = arith.constant 1 : index
    %c0_14 = arith.constant 0 : index
    %c0_15 = arith.constant 0 : index
    %28 = vector.load %arg2[%c1_13, %c0_14, %c0_15] : memref<9x128x128xbf16, #tpu.memory_space<vmem>>, vector<1x128x128xbf16>
    %29 = vector.shape_cast %28 : vector<1x128x128xbf16> to vector<128x128xbf16>
    %cst_16 = arith.constant dense<0.000000e+00> : vector<64x128xf32>
    %30 = tpu.matmul %27, %29, %cst_16 {dimension_numbers = #tpu.dot_dimension_numbers<[1], [0], [0], [1], [0, 0, 1, 1], [], []>} : vector<64x128xbf16>, vector<128x128xbf16>, vector<64x128xf32> -> vector<64x128xf32>
    %c2 = arith.constant 2 : index
    %c0_17 = arith.constant 0 : index
    %31 = vector.load %arg3[%c2, %c0_17] : memref<12x128xf32, #tpu.memory_space<vmem>>, vector<1x128xf32>
    %32 = vector.broadcast %31 : vector<1x128xf32> to vector<64x128xf32>
    %33 = arith.addf %30, %32 : vector<64x128xf32>
    %c0_18 = arith.constant 0 : index
    %c0_19 = arith.constant 0 : index
    %34 = vector.load %arg1[%c0_18, %c0_19] : memref<64x128xbf16, #tpu.memory_space<vmem>>, vector<64x128xbf16>
    %c2_20 = arith.constant 2 : index
    %c0_21 = arith.constant 0 : index
    %c0_22 = arith.constant 0 : index
    %35 = vector.load %arg2[%c2_20, %c0_21, %c0_22] : memref<9x128x128xbf16, #tpu.memory_space<vmem>>, vector<1x128x128xbf16>
    %36 = vector.shape_cast %35 : vector<1x128x128xbf16> to vector<128x128xbf16>
    %cst_23 = arith.constant dense<0.000000e+00> : vector<64x128xf32>
    %37 = tpu.matmul %34, %36, %cst_23 {dimension_numbers = #tpu.dot_dimension_numbers<[1], [0], [0], [1], [0, 0, 1, 1], [], []>} : vector<64x128xbf16>, vector<128x128xbf16>, vector<64x128xf32> -> vector<64x128xf32>
    %c3 = arith.constant 3 : index
    %c0_24 = arith.constant 0 : index
    %38 = vector.load %arg3[%c3, %c0_24] : memref<12x128xf32, #tpu.memory_space<vmem>>, vector<1x128xf32>
    %39 = vector.broadcast %38 : vector<1x128xf32> to vector<64x128xf32>
    %40 = arith.addf %37, %39 : vector<64x128xf32>
    %cst_25 = arith.constant 0.000000e+00 : f32
    %41 = vector.broadcast %cst_25 : f32 to vector<64x128xf32>
    %42 = arith.maximumf %40, %41 : vector<64x128xf32>
    %43 = arith.truncf %42 : vector<64x128xf32> to vector<64x128xbf16>
    %c3_26 = arith.constant 3 : index
    %c0_27 = arith.constant 0 : index
    %c0_28 = arith.constant 0 : index
    %44 = vector.load %arg2[%c3_26, %c0_27, %c0_28] : memref<9x128x128xbf16, #tpu.memory_space<vmem>>, vector<1x128x128xbf16>
    %45 = vector.shape_cast %44 : vector<1x128x128xbf16> to vector<128x128xbf16>
    %cst_29 = arith.constant dense<0.000000e+00> : vector<64x128xf32>
    %46 = tpu.matmul %43, %45, %cst_29 {dimension_numbers = #tpu.dot_dimension_numbers<[1], [0], [0], [1], [0, 0, 1, 1], [], []>} : vector<64x128xbf16>, vector<128x128xbf16>, vector<64x128xf32> -> vector<64x128xf32>
    %c4 = arith.constant 4 : index
    %c0_30 = arith.constant 0 : index
    %47 = vector.load %arg3[%c4, %c0_30] : memref<12x128xf32, #tpu.memory_space<vmem>>, vector<1x128xf32>
    %48 = vector.broadcast %47 : vector<1x128xf32> to vector<64x128xf32>
    %49 = arith.addf %46, %48 : vector<64x128xf32>
    %cst_31 = arith.constant 0.000000e+00 : f32
    %50 = vector.broadcast %cst_31 : f32 to vector<64x128xf32>
    %51 = arith.maximumf %49, %50 : vector<64x128xf32>
    %52 = arith.truncf %51 : vector<64x128xf32> to vector<64x128xbf16>
    %c4_32 = arith.constant 4 : index
    %c0_33 = arith.constant 0 : index
    %c0_34 = arith.constant 0 : index
    %53 = vector.load %arg2[%c4_32, %c0_33, %c0_34] : memref<9x128x128xbf16, #tpu.memory_space<vmem>>, vector<1x128x128xbf16>
    %54 = vector.shape_cast %53 : vector<1x128x128xbf16> to vector<128x128xbf16>
    %cst_35 = arith.constant dense<0.000000e+00> : vector<64x128xf32>
    %55 = tpu.matmul %52, %54, %cst_35 {dimension_numbers = #tpu.dot_dimension_numbers<[1], [0], [0], [1], [0, 0, 1, 1], [], []>} : vector<64x128xbf16>, vector<128x128xbf16>, vector<64x128xf32> -> vector<64x128xf32>
    %c5 = arith.constant 5 : index
    %c0_36 = arith.constant 0 : index
    %56 = vector.load %arg3[%c5, %c0_36] : memref<12x128xf32, #tpu.memory_space<vmem>>, vector<1x128xf32>
    %57 = vector.broadcast %56 : vector<1x128xf32> to vector<64x128xf32>
    %58 = arith.addf %55, %57 : vector<64x128xf32>
    %cst_37 = arith.constant 0.000000e+00 : f32
    %59 = vector.broadcast %cst_37 : f32 to vector<64x128xf32>
    %60 = arith.maximumf %58, %59 : vector<64x128xf32>
    %61 = arith.truncf %60 : vector<64x128xf32> to vector<64x128xbf16>
    %c5_38 = arith.constant 5 : index
    %c0_39 = arith.constant 0 : index
    %c0_40 = arith.constant 0 : index
    %62 = vector.load %arg2[%c5_38, %c0_39, %c0_40] : memref<9x128x128xbf16, #tpu.memory_space<vmem>>, vector<1x128x128xbf16>
    %63 = vector.shape_cast %62 : vector<1x128x128xbf16> to vector<128x128xbf16>
    %cst_41 = arith.constant dense<0.000000e+00> : vector<64x128xf32>
    %64 = tpu.matmul %61, %63, %cst_41 {dimension_numbers = #tpu.dot_dimension_numbers<[1], [0], [0], [1], [0, 0, 1, 1], [], []>} : vector<64x128xbf16>, vector<128x128xbf16>, vector<64x128xf32> -> vector<64x128xf32>
    %c6 = arith.constant 6 : index
    %c0_42 = arith.constant 0 : index
    %65 = vector.load %arg3[%c6, %c0_42] : memref<12x128xf32, #tpu.memory_space<vmem>>, vector<1x128xf32>
    %66 = vector.broadcast %65 : vector<1x128xf32> to vector<64x128xf32>
    %67 = arith.addf %64, %66 : vector<64x128xf32>
    %cst_43 = arith.constant 0.000000e+00 : f32
    %68 = vector.broadcast %cst_43 : f32 to vector<64x128xf32>
    %69 = arith.maximumf %67, %68 : vector<64x128xf32>
    %70 = arith.truncf %69 : vector<64x128xf32> to vector<64x128xbf16>
    %c6_44 = arith.constant 6 : index
    %c0_45 = arith.constant 0 : index
    %c0_46 = arith.constant 0 : index
    %71 = vector.load %arg2[%c6_44, %c0_45, %c0_46] : memref<9x128x128xbf16, #tpu.memory_space<vmem>>, vector<1x128x128xbf16>
    %72 = vector.shape_cast %71 : vector<1x128x128xbf16> to vector<128x128xbf16>
    %cst_47 = arith.constant dense<0.000000e+00> : vector<64x128xf32>
    %73 = tpu.matmul %70, %72, %cst_47 {dimension_numbers = #tpu.dot_dimension_numbers<[1], [0], [0], [1], [0, 0, 1, 1], [], []>} : vector<64x128xbf16>, vector<128x128xbf16>, vector<64x128xf32> -> vector<64x128xf32>
    %c7 = arith.constant 7 : index
    %c0_48 = arith.constant 0 : index
    %74 = vector.load %arg3[%c7, %c0_48] : memref<12x128xf32, #tpu.memory_space<vmem>>, vector<1x128xf32>
    %75 = vector.broadcast %74 : vector<1x128xf32> to vector<64x128xf32>
    %76 = arith.addf %73, %75 : vector<64x128xf32>
    %77 = arith.negf %76 : vector<64x128xf32>
    %78 = math.exp %77 : vector<64x128xf32>
    %cst_49 = arith.constant 1.000000e+00 : f32
    %79 = vector.broadcast %cst_49 : f32 to vector<64x128xf32>
    %80 = arith.addf %79, %78 : vector<64x128xf32>
    %81 = arith.divf %79, %80 : vector<64x128xf32>
    %82 = arith.mulf %33, %81 : vector<64x128xf32>
    %83 = tpu.iota {dimensions = array<i32: 1>} : vector<64x128xi32>
    %c16_i32 = arith.constant 16 : i32
    %84 = vector.broadcast %c16_i32 : i32 to vector<64x128xi32>
    %85 = arith.cmpi slt, %83, %84 : vector<64x128xi32>
    %cst_50 = arith.constant -1.000000e+30 : f32
    %86 = vector.broadcast %cst_50 : f32 to vector<64x128xf32>
    %87 = arith.select %85, %82, %86 : vector<64x128xi1>, vector<64x128xf32>
    %cst_51 = arith.constant dense<0xFF800000> : vector<64xf32>
    %88 = vector.multi_reduction <maximumf>, %87, %cst_51 [1] : vector<64x128xf32> to vector<64xf32>
    %89 = vector.shape_cast %88 : vector<64xf32> to vector<64x1xf32>
    %90 = vector.broadcast %89 : vector<64x1xf32> to vector<64x128xf32>
    %91 = arith.subf %87, %90 : vector<64x128xf32>
    %92 = math.exp %91 : vector<64x128xf32>
    %cst_52 = arith.constant dense<0.000000e+00> : vector<64xf32>
    %93 = vector.multi_reduction <add>, %92, %cst_52 [1] : vector<64x128xf32> to vector<64xf32>
    %94 = vector.shape_cast %93 : vector<64xf32> to vector<64x1xf32>
    %95 = tpu.reciprocal %94 {approx = true} : vector<64x1xf32> -> vector<64x1xf32>
    %96 = vector.broadcast %95 : vector<64x1xf32> to vector<64x128xf32>
    %97 = arith.mulf %92, %96 : vector<64x128xf32>
    %c0_53 = arith.constant 0 : index
    %c0_54 = arith.constant 0 : index
    %98 = vector.load %arg5[%c0_53, %c0_54] : memref<64x128xf32, #tpu.memory_space<vmem>>, vector<64x128xf32>
    tpu.vector_store %arg5[%c0_53, %c0_54], %97 {strides = array<i32>} : memref<64x128xf32, #tpu.memory_space<vmem>>, vector<64x128xf32>,
    %99 = arith.truncf %97 : vector<64x128xf32> to vector<64x128xbf16>
    %c7_55 = arith.constant 7 : index
    %c0_56 = arith.constant 0 : index
    %c0_57 = arith.constant 0 : index
    %100 = vector.load %arg2[%c7_55, %c0_56, %c0_57] : memref<9x128x128xbf16, #tpu.memory_space<vmem>>, vector<1x128x128xbf16>
    %101 = vector.shape_cast %100 : vector<1x128x128xbf16> to vector<128x128xbf16>
    %cst_58 = arith.constant dense<0.000000e+00> : vector<64x128xf32>
    %102 = tpu.matmul %99, %101, %cst_58 {dimension_numbers = #tpu.dot_dimension_numbers<[1], [0], [0], [1], [0, 0, 1, 1], [], []>} : vector<64x128xbf16>, vector<128x128xbf16>, vector<64x128xf32> -> vector<64x128xf32>
    %c8 = arith.constant 8 : index
    %c0_59 = arith.constant 0 : index
    %103 = vector.load %arg3[%c8, %c0_59] : memref<12x128xf32, #tpu.memory_space<vmem>>, vector<1x128xf32>
    %c9 = arith.constant 9 : index
    %c0_60 = arith.constant 0 : index
    %104 = vector.load %arg3[%c9, %c0_60] : memref<12x128xf32, #tpu.memory_space<vmem>>, vector<1x128xf32>
    %cst_61 = arith.constant dense<0.000000e+00> : vector<128xf32>
    %105 = vector.multi_reduction <add>, %102, %cst_61 [0] : vector<64x128xf32> to vector<128xf32>
    %106 = vector.shape_cast %105 : vector<128xf32> to vector<1x128xf32>
    %cst_62 = arith.constant 6.400000e+01 : f32
    %107 = vector.broadcast %cst_62 : f32 to vector<1x128xf32>
    %108 = arith.divf %106, %107 : vector<1x128xf32>
    %109 = vector.broadcast %108 : vector<1x128xf32> to vector<64x128xf32>
    %110 = arith.subf %102, %109 : vector<64x128xf32>
    %111 = arith.mulf %110, %110 : vector<64x128xf32>
    %cst_63 = arith.constant dense<0.000000e+00> : vector<128xf32>
    %112 = vector.multi_reduction <add>, %111, %cst_63 [0] : vector<64x128xf32> to vector<128xf32>
    %113 = vector.shape_cast %112 : vector<128xf32> to vector<1x128xf32>
    %cst_64 = arith.constant 6.400000e+01 : f32
    %114 = vector.broadcast %cst_64 : f32 to vector<1x128xf32>
    %115 = arith.divf %113, %114 : vector<1x128xf32>
    %cst_65 = arith.constant 9.99999974E-6 : f32
    %116 = vector.broadcast %cst_65 : f32 to vector<1x128xf32>
    %117 = arith.addf %115, %116 : vector<1x128xf32>
    %118 = math.rsqrt %117 : vector<1x128xf32>
    %119 = arith.mulf %103, %118 : vector<1x128xf32>
    %120 = vector.broadcast %119 : vector<1x128xf32> to vector<64x128xf32>
    %121 = arith.mulf %110, %120 : vector<64x128xf32>
    %122 = vector.broadcast %104 : vector<1x128xf32> to vector<64x128xf32>
    %123 = arith.addf %121, %122 : vector<64x128xf32>
    %cst_66 = arith.constant 0.000000e+00 : f32
    %124 = vector.broadcast %cst_66 : f32 to vector<64x128xf32>
    %125 = arith.maximumf %123, %124 : vector<64x128xf32>
    %126 = arith.truncf %125 : vector<64x128xf32> to vector<64x128xbf16>
    %c8_67 = arith.constant 8 : index
    %c0_68 = arith.constant 0 : index
    %c0_69 = arith.constant 0 : index
    %127 = vector.load %arg2[%c8_67, %c0_68, %c0_69] : memref<9x128x128xbf16, #tpu.memory_space<vmem>>, vector<1x128x128xbf16>
    %128 = vector.shape_cast %127 : vector<1x128x128xbf16> to vector<128x128xbf16>
    %cst_70 = arith.constant dense<0.000000e+00> : vector<64x128xf32>
    %129 = tpu.matmul %126, %128, %cst_70 {dimension_numbers = #tpu.dot_dimension_numbers<[1], [0], [0], [1], [0, 0, 1, 1], [], []>} : vector<64x128xbf16>, vector<128x128xbf16>, vector<64x128xf32> -> vector<64x128xf32>
    %c10 = arith.constant 10 : index
    %c0_71 = arith.constant 0 : index
    %130 = vector.load %arg3[%c10, %c0_71] : memref<12x128xf32, #tpu.memory_space<vmem>>, vector<1x128xf32>
    %c11 = arith.constant 11 : index
    %c0_72 = arith.constant 0 : index
    %131 = vector.load %arg3[%c11, %c0_72] : memref<12x128xf32, #tpu.memory_space<vmem>>, vector<1x128xf32>
    %cst_73 = arith.constant dense<0.000000e+00> : vector<128xf32>
    %132 = vector.multi_reduction <add>, %129, %cst_73 [0] : vector<64x128xf32> to vector<128xf32>
    %133 = vector.shape_cast %132 : vector<128xf32> to vector<1x128xf32>
    %cst_74 = arith.constant 6.400000e+01 : f32
    %134 = vector.broadcast %cst_74 : f32 to vector<1x128xf32>
    %135 = arith.divf %133, %134 : vector<1x128xf32>
    %136 = vector.broadcast %135 : vector<1x128xf32> to vector<64x128xf32>
    %137 = arith.subf %129, %136 : vector<64x128xf32>
    %138 = arith.mulf %137, %137 : vector<64x128xf32>
    %cst_75 = arith.constant dense<0.000000e+00> : vector<128xf32>
    %139 = vector.multi_reduction <add>, %138, %cst_75 [0] : vector<64x128xf32> to vector<128xf32>
    %140 = vector.shape_cast %139 : vector<128xf32> to vector<1x128xf32>
    %cst_76 = arith.constant 6.400000e+01 : f32
    %141 = vector.broadcast %cst_76 : f32 to vector<1x128xf32>
    %142 = arith.divf %140, %141 : vector<1x128xf32>
    %cst_77 = arith.constant 9.99999974E-6 : f32
    %143 = vector.broadcast %cst_77 : f32 to vector<1x128xf32>
    %144 = arith.addf %142, %143 : vector<1x128xf32>
    %145 = math.rsqrt %144 : vector<1x128xf32>
    %146 = arith.mulf %130, %145 : vector<1x128xf32>
    %147 = vector.broadcast %146 : vector<1x128xf32> to vector<64x128xf32>
    %148 = arith.mulf %137, %147 : vector<64x128xf32>
    %149 = vector.broadcast %131 : vector<1x128xf32> to vector<64x128xf32>
    %150 = arith.addf %148, %149 : vector<64x128xf32>
    %cst_78 = arith.constant 0.000000e+00 : f32
    %151 = vector.broadcast %cst_78 : f32 to vector<64x128xf32>
    %152 = arith.maximumf %150, %151 : vector<64x128xf32>
    %c0_79 = arith.constant 0 : index
    %c0_80 = arith.constant 0 : index
    %153 = vector.load %arg4[%c0_79, %c0_80] : memref<64x128xf32, #tpu.memory_space<vmem>>, vector<64x128xf32>
    tpu.vector_store %arg4[%c0_79, %c0_80], %152 {strides = array<i32>} : memref<64x128xf32, #tpu.memory_space<vmem>>, vector<64x128xf32>,
    return
  }
}

</mosaic_0001>

<bundles_post_ra>
// kernel: tpu_custom_call.1
= control target key start
LH: loop header
LB: loop body
LE: loop exit
PB: predicated region body
PF: predicated region fallthrough
CT: control target
= control target key end

     0   :  { %11 = vsyncpa [#allocation3], 0  ;;  %s2812_s0 = inlined_call_operand.hbm [shape: bf16[64,128], index: 0, kind: input, shape index: {}]   ;;  %s2813_s1 = inlined_call_operand.hbm [shape: bf16[64,128], index: 1, kind: input, shape index: {}]   ;;  %s2814_s2 = inlined_call_operand.hbm [shape: bf16[9,128,128], index: 2, kind: input, shape index: {}]   ;;  %s2815_s3 = inlined_call_operand.hbm [shape: f32[12,128], index: 3, kind: input, shape index: {}]   ;;  %s2816_s4 = inlined_call_operand.hbm [shape: f32[64,128], index: 4, kind: output, shape index: {0}]   ;;  %s2817_s5 = inlined_call_operand.hbm [shape: f32[64,128], index: 5, kind: output, shape index: {1}]  }
   0x1   :  { %12 = vsyncpa [#allocation6], 0 }
   0x2   :  { %13 = vsyncpa [#allocation9], 0 }
   0x3   :  { %14 = vsyncpa [#allocation4], 0 }
   0x4   :  { %15 = vsyncpa [#allocation12], 0  ;;  %s2573_s18 = smov [#allocation5]   ;;  %s2574_s20 = smov [#allocation2]  }
   0x5   :  { %s33_s19 = sshll.u32 %s2573_s18, 4  ;;  %s21_s21 = sshll.u32 %s2574_s20, 4  ;;  %s34_s19 = int_to_ptr.vmem [resolvable:$true] %s33_s19  ;;  %s2613_s21 = int_to_ptr.vmem [resolvable:$true] %s21_s21 }
   0x6   :  { %s2431_s24 = scalar_lea.hbm %s2813_s1, 512 }
   0x7   :  { %p2432_p0 = scmp.ne.s32.totalorder %s2813_s1, %s2431_s24  ;;  %p2435_p1 = scmp.lt.u32.totalorder %s2431_s24, %s2813_s1 }
   0x9   :  { %p2437_p2 = pnand %p2435_p1, %p2432_p0 }
   0xb   :  { %2440 = shalt.err (!%p2437_p2)
}
   0xc   :  { %s2441_s29 = scalar_lea.vmem %s34_s19, 512  ;;  %p2446_p4 = scmp.lt.s32.totalorder %s34_s19, %s34_s19 }
   0xd   :  { %p2442_p3 = scmp.ne.s32.totalorder %s34_s19, %s2441_s29  ;;  %p2447_p5 = scmp.lt.s32.totalorder %s2441_s29, %s2441_s29 }
   0xf   :  { %p2448_p6 = por %p2447_p5, %p2446_p4 }
  0x11   :  { %p2449_p7 = pnand %p2448_p6, %p2442_p3 }
  0x13   :  { %2452 = shalt.err (!%p2449_p7)
}
  0x14   :  { %s2575_s30 = smov 64   ;;  %s2576_s6 = smov 4  }
  0x15   :  { %39 = dma.hbm_to_vmem [thread:$0]  %s2813_s1, 512, %s34_s19, [#allocation6], %s2575_s30, %s2575_s30, %s2576_s6  }
  0x16   :  { %s2453_s11 = scalar_lea.hbm %s2812_s0, 512 }
  0x17   :  { %p2454_p8 = scmp.ne.s32.totalorder %s2812_s0, %s2453_s11  ;;  %p2457_p9 = scmp.lt.u32.totalorder %s2453_s11, %s2812_s0 }
  0x19   :  { %p2459_p10 = pnand %p2457_p9, %p2454_p8 }
  0x1b   :  { %2462 = shalt.err (!%p2459_p10)
}
  0x1c   :  { %s2463_s16 = scalar_lea.vmem %s2613_s21, 512  ;;  %p2468_p12 = scmp.lt.s32.totalorder %s2613_s21, %s2613_s21 }
  0x1d   :  { %p2464_p11 = scmp.ne.s32.totalorder %s2613_s21, %s2463_s16  ;;  %p2469_p13 = scmp.lt.s32.totalorder %s2463_s16, %s2463_s16 }
  0x1f   :  { %p2470_p0 = por %p2469_p13, %p2468_p12 }
  0x21   :  { %p2471_p1 = pnand %p2470_p0, %p2464_p11 }
  0x23   :  { %2474 = shalt.err (!%p2471_p1)
}
  0x24   :  { %27 = dma.hbm_to_vmem [thread:$0]  %s2812_s0, 512, %s2613_s21, [#allocation3], %s2575_s30, %s2575_s30, %s2576_s6  }
  0x25   :  { %s2577_s18 = smov [#allocation7]   ;;  %s2578_s20 = smov [#allocation8]  }
  0x26   :  { %s45_s19 = sshll.u32 %s2577_s18, 4  ;;  %s57_s22 = sshll.u32 %s2578_s20, 4  ;;  %s46_s19 = int_to_ptr.vmem [resolvable:$true] %s45_s19  ;;  %s2650_s22 = int_to_ptr.vmem [resolvable:$true] %s57_s22 }
  0x27   :  { %s2475_s25 = scalar_lea.hbm %s2814_s2, 9216 }
  0x28   :  { %p2476_p2 = scmp.ne.s32.totalorder %s2814_s2, %s2475_s25  ;;  %p2479_p3 = scmp.lt.u32.totalorder %s2475_s25, %s2814_s2 }
  0x2a   :  { %p2481_p4 = pnand %p2479_p3, %p2476_p2 }
  0x2c   :  { %2484 = shalt.err (!%p2481_p4)
}
  0x2d   :  { %s2485_s0 = scalar_lea.vmem %s46_s19, 9216  ;;  %p2490_p6 = scmp.lt.s32.totalorder %s46_s19, %s46_s19 }
  0x2e   :  { %p2486_p5 = scmp.ne.s32.totalorder %s46_s19, %s2485_s0  ;;  %p2491_p7 = scmp.lt.s32.totalorder %s2485_s0, %s2485_s0 }
  0x30   :  { %p2492_p8 = por %p2491_p7, %p2490_p6 }
  0x32   :  { %p2493_p9 = pnand %p2492_p8, %p2486_p5 }
  0x34   :  { %2496 = shalt.err (!%p2493_p9)
}
  0x35   :  { %51 = dma.hbm_to_vmem [thread:$0]  %s2814_s2, 9216, %s46_s19, [#allocation6], %s2575_s30, %s2575_s30, %s2576_s6  }
  0x36   :  { %s2497_s10 = scalar_lea.hbm %s2815_s3, 256 }
  0x37   :  { %p2498_p10 = scmp.ne.s32.totalorder %s2815_s3, %s2497_s10  ;;  %p2501_p11 = scmp.lt.u32.totalorder %s2497_s10, %s2815_s3 }
  0x39   :  { %p2503_p12 = pnand %p2501_p11, %p2498_p10 }
  0x3b   :  { %2506 = shalt.err (!%p2503_p12)
}
  0x3c   :  { %s2507_s15 = scalar_lea.vmem %s2650_s22, 256  ;;  %p2512_p0 = scmp.lt.s32.totalorder %s2650_s22, %s2650_s22 }
  0x3d   :  { %p2508_p13 = scmp.ne.s32.totalorder %s2650_s22, %s2507_s15  ;;  %p2513_p1 = scmp.lt.s32.totalorder %s2507_s15, %s2507_s15 }
  0x3f   :  { %p2514_p2 = por %p2513_p1, %p2512_p0 }
  0x41   :  { %p2515_p3 = pnand %p2514_p2, %p2508_p13 }
  0x43   :  { %2518 = shalt.err (!%p2515_p3)
}
  0x44   :  { %s2579_s2 = smov 128   ;;  %s2580_s30 = smov 8  }
  0x45   :  { %63 = dma.hbm_to_vmem [thread:$0]  %s2815_s3, 256, %s2650_s22, [#allocation9], %s2579_s2, %s2579_s2, %s2580_s30  }
  0x46   :  { %2563 = dma.done.wait [#allocation3], 512  }
  0x47   :  { %2564 = vsyncadd [#allocation3], 4294966784 }
  0x48   :  { %2565 = dma.done.wait [#allocation6], 9728  }
  0x49   :  { %2566 = vsyncadd [#allocation6], 4294957568 }
  0x4a   :  { %2567 = dma.done.wait [#allocation9], 256  }
  0x4b   :  { %2568 = vsyncadd [#allocation9], 4294967040  ;;  %v2281_v0 = vld [vmem:[#allocation7] sm:$0xff]   ;;  %v2282_v1 = vld [vmem:[#allocation7 + $0x8] sm:$0xff]   ;;  %s2581_s3 = smov [#allocation11]  }
  0x4c   :  { %2039 = vmatprep.subr.bf16.mxu0 %v2281_v0  ;;  %v2283_v2 = vld [vmem:[#allocation7 + $0x10] sm:$0xff]   ;;  %v2284_v3 = vld [vmem:[#allocation7 + $0x18] sm:$0xff]   ;;  %v2289_v4 = vld [vmem:[#allocation2] sm:$0xff]   ;;  %s1816_s1 = sshll.u32 %s2581_s3, 4  ;;  %s1817_s1 = int_to_ptr.vmem [resolvable:$true] %s1816_s1 }
  0x4d   :  { %2040 = vmatpush3.bf16.msra.mxu0 %v2281_v0  ;;  %2055 = vmatprep.mubr.bf16.mxu0 %v2289_v4  ;;  %v2285_v5 = vld [vmem:[#allocation7 + $0x20] sm:$0xff]   ;;  %v2286_v6 = vld [vmem:[#allocation7 + $0x28] sm:$0xff]   ;;  %v2287_v7 = vld [vmem:[#allocation7 + $0x30] sm:$0xff]   ;;  %s2519_s17 = scalar_lea.vmem %s1817_s1, 1024  ;;  %p2524_p5 = scmp.lt.s32.totalorder %s1817_s1, %s1817_s1 }
  0x4e   :  { %2041 = vmatprep.subr.bf16.mxu0 %v2282_v1  ;;  %v2288_v8 = vld [vmem:[#allocation7 + $0x38] sm:$0xff]   ;;  %v2293_v9 = vld [vmem:[#allocation7 + $0x80] sm:$0xff]   ;;  %v2290_v10 = vld [vmem:[#allocation2 + $0x8] sm:$0xff]   ;;  %p2520_p4 = scmp.ne.s32.totalorder %s1817_s1, %s2519_s17  ;;  %p2525_p6 = scmp.lt.s32.totalorder %s2519_s17, %s2519_s17 }
  0x4f   :  { %v2291_v11 = vld [vmem:[#allocation2 + $0x10] sm:$0xff]   ;;  %v2294_v12 = vld [vmem:[#allocation7 + $0x88] sm:$0xff]   ;;  %v2292_v14 = vld [vmem:[#allocation2 + $0x18] sm:$0xff]  }
  0x50   :  { %v2295_v13 = vld [vmem:[#allocation7 + $0x90] sm:$0xff]   ;;  %v2301_v15 = vld [vmem:[#allocation5] sm:$0xff]   ;;  %v2296_v16 = vld [vmem:[#allocation7 + $0x98] sm:$0xff]   ;;  %p2526_p7 = por %p2525_p6, %p2524_p5 }
  0x51   :  { %2042 = vmatpush3.bf16.msra.mxu0 %v2282_v1  ;;  %v2297_v17 = vld [vmem:[#allocation7 + $0xa0] sm:$0xff]   ;;  %v2298_v18 = vld [vmem:[#allocation7 + $0xa8] sm:$0xff]   ;;  %v2299_v19 = vld [vmem:[#allocation7 + $0xb0] sm:$0xff]  }
  0x52   :  { %2043 = vmatprep.subr.bf16.mxu0 %v2283_v2  ;;  %v2300_v20 = vld [vmem:[#allocation7 + $0xb8] sm:$0xff]   ;;  %v2302_v21 = vld [vmem:[#allocation5 + $0x8] sm:$0xff]   ;;  %v2303_v22 = vld [vmem:[#allocation5 + $0x10] sm:$0xff]   ;;  %p2527_p8 = pnand %p2526_p7, %p2520_p4 }
  0x53   :  { %v2304_v23 = vld [vmem:[#allocation5 + $0x18] sm:$0xff]   ;;  %v2305_v24 = vld [vmem:[#allocation7 + $0x40] sm:$0xff]   ;;  %v2306_v25 = vld [vmem:[#allocation7 + $0x48] sm:$0xff]  }
  0x54   :  { %2063 = vmatprep.subr.bf16.mxu1 %v2305_v24  ;;  %v2307_v26 = vld [vmem:[#allocation7 + $0x50] sm:$0xff]   ;;  %v2308_v27 = vld [vmem:[#allocation7 + $0x58] sm:$0xff]   ;;  %v2309_v28 = vld [vmem:[#allocation7 + $0x60] sm:$0xff]  }
  0x55   :  { %2044 = vmatpush3.bf16.msra.mxu0 %v2283_v2  ;;  %2064 = vmatpush3.bf16.msra.mxu1 %v2305_v24  ;;  %v2310_v29 = vld [vmem:[#allocation7 + $0x68] sm:$0xff]   ;;  %v2311_v30 = vld [vmem:[#allocation7 + $0x70] sm:$0xff]   ;;  %v2312_v31 = vld [vmem:[#allocation7 + $0x78] sm:$0xff]  }
  0x56   :  { %2045 = vmatprep.subr.bf16.mxu0 %v2284_v3  ;;  %2065 = vmatprep.subr.bf16.mxu1 %v2306_v25  ;;  %v2687_v32 = vld [vmem:[#allocation7 + $0xc0] sm:$0xff]  }
  0x57   :  { %v1856_v0 = vld [vmem:[#allocation8 + $0x3] ss:$0 sm:$0xff] }
  0x59   :  { %2046 = vmatpush3.bf16.msra.mxu0 %v2284_v3  ;;  %2066 = vmatpush3.bf16.msra.mxu1 %v2306_v25 }
  0x5a   :  { %2047 = vmatprep.subr.bf16.mxu0 %v2285_v5  ;;  %2067 = vmatprep.subr.bf16.mxu1 %v2307_v26 }
  0x5d   :  { %2048 = vmatpush3.bf16.msra.mxu0 %v2285_v5  ;;  %2068 = vmatpush3.bf16.msra.mxu1 %v2307_v26 }
  0x5e   :  { %2049 = vmatprep.subr.bf16.mxu0 %v2286_v6  ;;  %2069 = vmatprep.subr.bf16.mxu1 %v2308_v27 }
  0x61   :  { %2050 = vmatpush3.bf16.msra.mxu0 %v2286_v6  ;;  %2070 = vmatpush3.bf16.msra.mxu1 %v2308_v27 }
  0x62   :  { %2051 = vmatprep.subr.bf16.mxu0 %v2287_v7  ;;  %2071 = vmatprep.subr.bf16.mxu1 %v2309_v28 }
  0x65   :  { %2052 = vmatpush3.bf16.msra.mxu0 %v2287_v7  ;;  %2072 = vmatpush3.bf16.msra.mxu1 %v2309_v28 }
  0x66   :  { %2053 = vmatprep.subr.bf16.mxu0 %v2288_v8  ;;  %2073 = vmatprep.subr.bf16.mxu1 %v2310_v29 }
  0x69   :  { %2054 = vmatpush3.bf16.msra.mxu0 %v2288_v8  ;;  %2074 = vmatpush3.bf16.msra.mxu1 %v2310_v29 }
  0x6a   :  { %2087 = vmatprep.subr.bf16.mxu0 %v2293_v9  ;;  %2075 = vmatprep.subr.bf16.mxu1 %v2311_v30 }
  0x6c   :  { %2056 = vmatmul.mubr.bf16.vlgmr.msra.gmra.mrb[0].mxu0 %v2290_v10 }
  0x6d   :  { %2059 = vmatprep.mubr.bf16.mxu0 %v2291_v11  ;;  %2088 = vmatpush3.bf16.msra.mxu0 %v2293_v9 }
  0x6e   :  { %2089 = vmatprep.subr.bf16.mxu0 %v2294_v12  ;;  %2076 = vmatpush3.bf16.msra.mxu1 %v2311_v30 }
  0x6f   :  { %2077 = vmatprep.subr.bf16.mxu1 %v2312_v31 }
  0x71   :  { %2090 = vmatpush3.bf16.msra.mxu0 %v2294_v12 }
  0x72   :  { %2091 = vmatprep.subr.bf16.mxu0 %v2295_v13  ;;  %2078 = vmatpush3.bf16.msra.mxu1 %v2312_v31 }
  0x73   :  { %2111 = vmatprep.subr.bf16.mxu1 %v2687_v32 }
  0x74   :  { %2060 = vmatmul.mubr.bf16.gmra.mrb[4].mxu0 %v2292_v14 }
  0x75   :  { %2092 = vmatpush3.bf16.msra.mxu0 %v2295_v13  ;;  %2103 = vmatprep.mubr.bf16.mxu0 %v2301_v15 }
  0x76   :  { %2093 = vmatprep.subr.bf16.mxu0 %v2296_v16 }
  0x79   :  { %2094 = vmatpush3.bf16.msra.mxu0 %v2296_v16 }
  0x7a   :  { %2095 = vmatprep.subr.bf16.mxu0 %v2297_v17 }
  0x7d   :  { %2096 = vmatpush3.bf16.msra.mxu0 %v2297_v17 }
  0x7e   :  { %2097 = vmatprep.subr.bf16.mxu0 %v2298_v18 }
  0x81   :  { %2098 = vmatpush3.bf16.msra.mxu0 %v2298_v18 }
  0x82   :  { %2099 = vmatprep.subr.bf16.mxu0 %v2299_v19 }
  0x85   :  { %2100 = vmatpush3.bf16.msra.mxu0 %v2299_v19 }
  0x86   :  { %2101 = vmatprep.subr.bf16.mxu0 %v2300_v20 }
  0x89   :  { %2102 = vmatpush3.bf16.msra.mxu0 %v2300_v20 }
  0x8c   :  { %2104 = vmatmul.mubr.bf16.vlgmr.msra.gmra.mrb[8].mxu0 %v2302_v21 }
  0x8d   :  { %2107 = vmatprep.mubr.bf16.mxu0 %v2303_v22 }
  0x94   :  { %2108 = vmatmul.mubr.bf16.gmra.mrb[12].mxu0 %v2304_v23 }
 0x13f   :  { %v2057_v33 = vpop.f32.mrb[0].mxu0 }
 0x140   :  { %v207_v34 = vpop.f32.mrb[1].mxu0 }
 0x141   :  { %v2058_v35 = vpop.f32.mrb[2].mxu0 }
 0x142   :  { %v210_v36 = vpop.f32.mrb[3].mxu0 }
 0x143   :  { %v240_v37 = vadd.f32 %v210_v36, %v207_v34 }
 0x145   :  { %v241_v38 = vadd.f32 %v2057_v33, %v240_v37 }
 0x147   :  { %v2061_v39 = vpop.f32.mrb[4].mxu0  ;;  %v242_v40 = vadd.f32 %v2058_v35, %v241_v38 }
 0x148   :  { %v223_v41 = vpop.f32.mrb[5].mxu0 }
 0x149   :  { %v243_v42 = vadd.f32 %v242_v40, %v223_v41  ;;  %v2062_v43 = vpop.f32.mrb[6].mxu0 }
 0x14a   :  { %v226_v44 = vpop.f32.mrb[7].mxu0 }
 0x14b   :  { %v244_v45 = vadd.f32 %v243_v42, %v226_v44 }
 0x14d   :  { %v245_v46 = vadd.f32 %v2061_v39, %v244_v45 }
 0x14f   :  { %v246_v47 = vadd.f32 %v2062_v43, %v245_v46 }
 0x151   :  { %v247_v48 = vrot.slane %v246_v47, 4 }
 0x153   :  { %v248_v49 = vadd.f32 %v247_v48, %v246_v47 }
 0x155   :  { %v249_v50 = vrot.slane %v248_v49, 2 }
 0x157   :  { %v250_v51 = vadd.f32 %v249_v50, %v248_v49 }
 0x159   :  { %v251_v52 = vrot.slane %v250_v51, 1 }
 0x15b   :  { %v252_v53 = vadd.f32 %v251_v52, %v250_v51  ;;  %v288_v52 = vlaneseq }
 0x15d   :  { %v254_v54 = vmul.f32 0.015625, %v252_v53  ;;  %v289_v53 = vshrl.u32 %v288_v52, 7 }
 0x15f   :  { %v2690_v55 = vsub.f32 %v207_v34, %v254_v54  ;;  %v2692_v56 = vsub.f32 %v210_v36, %v254_v54  ;;  %v2694_v57 = vsub.f32 %v2057_v33, %v254_v54  ;;  %v2696_v58 = vsub.f32 %v2058_v35, %v254_v54  ;;  %v2105_v59 = vpop.f32.mrb[8].mxu0 }
 0x160   :  { %v2698_v60 = vsub.f32 %v223_v41, %v254_v54  ;;  %v2700_v61 = vsub.f32 %v226_v44, %v254_v54  ;;  %v2702_v62 = vsub.f32 %v2061_v39, %v254_v54  ;;  %v2704_v63 = vsub.f32 %v2062_v43, %v254_v54  ;;  %v595_v1 = vpop.f32.mrb[9].mxu0  ;;  %v238_v54 = vld [vmem:[#allocation8] sm:$0x1] }
 0x161   :  { %v263_v2 = vmul.f32 %v2690_v55, %v2690_v55  ;;  %v264_v3 = vmul.f32 %v2692_v56, %v2692_v56  ;;  %v2106_v4 = vpop.f32.mrb[10].mxu0  ;;  %v265_v5 = vmul.f32 %v2694_v57, %v2694_v57  ;;  %v604_v8 = vadd.f32 %v2105_v59, %v1856_v0 }
 0x162   :  { %v598_v6 = vpop.f32.mrb[11].mxu0  ;;  %v596_v9 = vadd.f32 %v1856_v0, %v595_v1  ;;  %v607_v10 = vadd.f32 %v2106_v4, %v1856_v0  ;;  %v266_v11 = vmul.f32 %v2696_v58, %v2696_v58  ;;  %v267_v18 = vmul.f32 %v2698_v60, %v2698_v60 }
 0x163   :  { %v271_v7 = vadd.f32 %v264_v3, %v263_v2  ;;  %v599_v12 = vadd.f32 %v1856_v0, %v598_v6  ;;  %v628_v14 = vmax.f32 %v604_v8, 0.0  ;;  %v268_v25 = vmul.f32 %v2700_v61, %v2700_v61  ;;  %v1846_v3 = vld [vmem:[#allocation8 + $0x1] ss:$0 sm:$0xff] }
 0x164   :  { %v626_v15 = vmax.f32 %v596_v9, 0.0  ;;  %v629_v16 = vmax.f32 %v607_v10, 0.0  ;;  %v269_v33 = vmul.f32 %v2702_v62, %v2702_v62  ;;  %v270_v38 = vmul.f32 %v2704_v63, %v2704_v63 }
 0x165   :  { %v272_v13 = vadd.f32 %v271_v7, %v265_v5  ;;  %v627_v17 = vmax.f32 %v599_v12, 0.0  ;;  %v2731_v59 = vsub.s32 0, %v289_v53 }
 0x166   :  { %v2716_v20 = vpack.c.bf16 %v629_v16, %v628_v14 }
 0x167   :  { %v273_v19 = vadd.f32 %v272_v13, %v266_v11  ;;  %v2109_v21 = vpop.f32.mrb[12].mxu0  ;;  %v2718_v22 = vpack.c.bf16 %v627_v17, %v626_v15 }
 0x168   :  { %v620_v23 = vadd.f32 %v2109_v21, %v1856_v0  ;;  %v611_v24 = vpop.f32.mrb[13].mxu0 }
 0x169   :  { %v274_v26 = vadd.f32 %v273_v19, %v267_v18  ;;  %v612_v27 = vadd.f32 %v1856_v0, %v611_v24  ;;  %v2110_v28 = vpop.f32.mrb[14].mxu0 }
 0x16a   :  { %v632_v29 = vmax.f32 %v620_v23, 0.0  ;;  %v623_v30 = vadd.f32 %v2110_v28, %v1856_v0  ;;  %v614_v31 = vpop.f32.mrb[15].mxu0  ;;  %v2316_v28 = vld [vmem:[#allocation7 + $0xd8] sm:$0xff]  }
 0x16b   :  { %v275_v34 = vadd.f32 %v274_v26, %v268_v25  ;;  %v630_v35 = vmax.f32 %v612_v27, 0.0  ;;  %v615_v36 = vadd.f32 %v1856_v0, %v614_v31  ;;  %v2315_v27 = vld [vmem:[#allocation7 + $0xd0] sm:$0xff]  }
 0x16c   :  { %v633_v37 = vmax.f32 %v623_v30, 0.0  ;;  %v2318_v30 = vld [vmem:[#allocation7 + $0xe8] sm:$0xff]   ;;  %v2319_v31 = vld [vmem:[#allocation7 + $0xf0] sm:$0xff]  }
 0x16d   :  { %v276_v39 = vadd.f32 %v275_v34, %v269_v33  ;;  %v631_v40 = vmax.f32 %v615_v36, 0.0  ;;  %v2322_v33 = vld [vmem:[#allocation7 + $0x108] sm:$0xff]   ;;  %v2323_v34 = vld [vmem:[#allocation7 + $0x110] sm:$0xff]   ;;  %v2325_v36 = vld [vmem:[#allocation7 + $0x120] sm:$0xff]  }
 0x16e   :  { %v2726_v41 = vpack.c.bf16 %v633_v37, %v632_v29  ;;  %v2317_v29 = vld [vmem:[#allocation7 + $0xe0] sm:$0xff]   ;;  %v2326_v37 = vld [vmem:[#allocation7 + $0x128] sm:$0xff]  }
 0x16f   :  { %v277_v42 = vadd.f32 %v276_v39, %v270_v38  ;;  %v2728_v43 = vpack.c.bf16 %v631_v40, %v630_v35  ;;  %v2324_v35 = vld [vmem:[#allocation7 + $0x118] sm:$0xff]   ;;  %v2329_v39 = vld [vmem:[#allocation7 + $0x140] sm:$0xff]   ;;  %v2330_v40 = vld [vmem:[#allocation7 + $0x148] sm:$0xff]  }
 0x170   :  { %v2328_v38 = vld [vmem:[#allocation7 + $0x138] sm:$0xff]  }
 0x171   :  { %v278_v44 = vrot.slane %v277_v42, 4 }
 0x173   :  { %v279_v45 = vadd.f32 %v278_v44, %v277_v42  ;;  %v2332_v42 = vld [vmem:[#allocation7 + $0x158] sm:$0xff]   ;;  %v2334_v44 = vld [vmem:[#allocation7 + $0x168] sm:$0xff]  }
 0x175   :  { %v280_v46 = vrot.slane %v279_v45, 2 }
 0x177   :  { %v281_v47 = vadd.f32 %v280_v46, %v279_v45 }
 0x179   :  { %v282_v48 = vrot.slane %v281_v47, 1 }
 0x17b   :  { %v283_v49 = vadd.f32 %v282_v48, %v281_v47 }
 0x17d   :  { %v284_v50 = vmul.f32 0.015625, %v283_v49 }
 0x17f   :  { %v285_v51 = vadd.f32 1e-05, %v284_v50 }
 0x181   :  { %2361 = vrsqrt.f32 %v285_v51 }
 0x18b   :  { %v2362_v0 = vpop.eup %2361 }
 0x18c   :  { %v287_v1 = vmul.f32 %v2362_v0, %v238_v54  ;;  %v1869_v54 = vld [vmem:[#allocation8 + $0x4] ss:$0 sm:$0xff] }
 0x18e   :  { %v291_v2 = vrot.slane %v287_v1, %v2731_v59 }
 0x190   :  { %v297_v4 = vmul.f32 %v291_v2, %v2700_v61  ;;  %v292_v5 = vmul.f32 %v291_v2, %v2690_v55  ;;  %v293_v6 = vmul.f32 %v291_v2, %v2692_v56  ;;  %v294_v7 = vmul.f32 %v291_v2, %v2694_v57 }
 0x191   :  { %v295_v8 = vmul.f32 %v291_v2, %v2696_v58  ;;  %v296_v9 = vmul.f32 %v291_v2, %v2698_v60  ;;  %v298_v10 = vmul.f32 %v291_v2, %v2702_v62  ;;  %v299_v11 = vmul.f32 %v291_v2, %v2704_v63  ;;  %v2314_v63 = vld [vmem:[#allocation7 + $0xc8] sm:$0xff]  }
 0x192   :  { %v309_v12 = vadd.f32 %v1846_v3, %v297_v4  ;;  %v304_v13 = vadd.f32 %v1846_v3, %v292_v5  ;;  %v305_v14 = vadd.f32 %v1846_v3, %v293_v6  ;;  %v306_v15 = vadd.f32 %v1846_v3, %v294_v7 }
 0x193   :  { %v307_v16 = vadd.f32 %v1846_v3, %v295_v8  ;;  %v308_v61 = vadd.f32 %v1846_v3, %v296_v9  ;;  %v310_v17 = vadd.f32 %v1846_v3, %v298_v10  ;;  %v311_v55 = vadd.f32 %v1846_v3, %v299_v11 }
 0x194   :  { %v312_v18 = vmax.f32 %v304_v13, 0.0  ;;  %v313_v56 = vmax.f32 %v305_v14, 0.0  ;;  %v314_v19 = vmax.f32 %v306_v15, 0.0  ;;  %v317_v57 = vmax.f32 %v309_v12, 0.0 }
 0x195   :  { %v315_v21 = vmax.f32 %v307_v16, 0.0  ;;  %v316_v58 = vmax.f32 %v308_v61, 0.0  ;;  %v318_v23 = vmax.f32 %v310_v17, 0.0  ;;  %v319_v60 = vmax.f32 %v311_v55, 0.0 }
 0x196   :  { %v320_v24 = vpack.c.bf16 %v313_v56, %v312_v18 }
 0x197   :  { %v321_v62 = vpack.c.bf16 %v315_v21, %v314_v19  ;;  %v322_v25 = vpack.c.bf16 %v317_v57, %v316_v58  ;;  %v323_v26 = vpack.c.bf16 %v319_v60, %v318_v23 }
 0x198   :  { %2079 = vmatprep.mubr.bf16.mxu1 %v320_v24  ;;  %v2335_v24 = vld [vmem:[#allocation7 + $0x170] sm:$0xff]  }
 0x199   :  { %2080 = vmatmul.mubr.bf16.vlgmr.msra.gmra.mrb[0].mxu1 %v321_v62  ;;  %v2336_v62 = vld [vmem:[#allocation7 + $0x178] sm:$0xff]  }
 0x19a   :  { %2112 = vmatpush3.bf16.msra.mxu1 %v2687_v32  ;;  %2083 = vmatprep.mubr.bf16.mxu1 %v322_v25  ;;  %v2320_v32 = vld [vmem:[#allocation7 + $0xf8] sm:$0xff]   ;;  %v2337_v25 = vld [vmem:[#allocation7 + $0x180] sm:$0xff]  }
 0x19b   :  { %2113 = vmatprep.subr.bf16.mxu1 %v2314_v63 }
 0x19e   :  { %2114 = vmatpush3.bf16.msra.mxu1 %v2314_v63  ;;  %v2338_v63 = vld [vmem:[#allocation7 + $0x188] sm:$0xff]  }
 0x19f   :  { %2115 = vmatprep.subr.bf16.mxu1 %v2315_v27 }
 0x1a1   :  { %2084 = vmatmul.mubr.bf16.gmra.mrb[4].mxu1 %v323_v26  ;;  %v2339_v26 = vld [vmem:[#allocation7 + $0x190] sm:$0xff]  }
 0x1a2   :  { %2116 = vmatpush3.bf16.msra.mxu1 %v2315_v27  ;;  %2127 = vmatprep.mubr.bf16.mxu1 %v2718_v22  ;;  %v2321_v22 = vld [vmem:[#allocation7 + $0x100] sm:$0xff]   ;;  %v2340_v27 = vld [vmem:[#allocation7 + $0x198] sm:$0xff]  }
 0x1a3   :  { %2117 = vmatprep.subr.bf16.mxu1 %v2316_v28  ;;  %2135 = vmatprep.subr.bf16.mxu0 %v2321_v22 }
 0x1a4   :  { %2136 = vmatpush3.bf16.msra.mxu0 %v2321_v22 }
 0x1a5   :  { %2137 = vmatprep.subr.bf16.mxu0 %v2322_v33 }
 0x1a6   :  { %2118 = vmatpush3.bf16.msra.mxu1 %v2316_v28  ;;  %v2341_v28 = vld [vmem:[#allocation7 + $0x1a0] sm:$0xff]  }
 0x1a7   :  { %2119 = vmatprep.subr.bf16.mxu1 %v2317_v29 }
 0x1a8   :  { %2138 = vmatpush3.bf16.msra.mxu0 %v2322_v33 }
 0x1a9   :  { %2139 = vmatprep.subr.bf16.mxu0 %v2323_v34 }
 0x1aa   :  { %2120 = vmatpush3.bf16.msra.mxu1 %v2317_v29  ;;  %v2342_v29 = vld [vmem:[#allocation7 + $0x1a8] sm:$0xff]  }
 0x1ab   :  { %2121 = vmatprep.subr.bf16.mxu1 %v2318_v30 }
 0x1ac   :  { %2140 = vmatpush3.bf16.msra.mxu0 %v2323_v34 }
 0x1ad   :  { %2141 = vmatprep.subr.bf16.mxu0 %v2324_v35 }
 0x1ae   :  { %2122 = vmatpush3.bf16.msra.mxu1 %v2318_v30  ;;  %v1878_v30 = vld [vmem:[#allocation8 + $0x5] ss:$0 sm:$0xff] }
 0x1af   :  { %2123 = vmatprep.subr.bf16.mxu1 %v2319_v31 }
 0x1b0   :  { %2142 = vmatpush3.bf16.msra.mxu0 %v2324_v35 }
 0x1b1   :  { %2143 = vmatprep.subr.bf16.mxu0 %v2325_v36 }
 0x1b2   :  { %2124 = vmatpush3.bf16.msra.mxu1 %v2319_v31 }
 0x1b3   :  { %2125 = vmatprep.subr.bf16.mxu1 %v2320_v32 }
 0x1b4   :  { %2144 = vmatpush3.bf16.msra.mxu0 %v2325_v36 }
 0x1b5   :  { %2145 = vmatprep.subr.bf16.mxu0 %v2326_v37 }
 0x1b6   :  { %2126 = vmatpush3.bf16.msra.mxu1 %v2320_v32 }
 0x1b7   :  { %2159 = vmatprep.subr.bf16.mxu1 %v2329_v39 }
 0x1b8   :  { %2146 = vmatpush3.bf16.msra.mxu0 %v2326_v37 }
 0x1b9   :  { %2128 = vmatmul.mubr.bf16.vlgmr.msra.gmra.mrb[8].mxu1 %v2716_v20  ;;  %v2327_v20 = vld [vmem:[#allocation7 + $0x130] sm:$0xff]  }
 0x1ba   :  { %2131 = vmatprep.mubr.bf16.mxu1 %v2728_v43  ;;  %2147 = vmatprep.subr.bf16.mxu0 %v2327_v20  ;;  %v2333_v43 = vld [vmem:[#allocation7 + $0x160] sm:$0xff]  }
 0x1bb   :  { %2160 = vmatpush3.bf16.msra.mxu1 %v2329_v39 }
 0x1bc   :  { %2148 = vmatpush3.bf16.msra.mxu0 %v2327_v20  ;;  %2161 = vmatprep.subr.bf16.mxu1 %v2330_v40 }
 0x1bd   :  { %2149 = vmatprep.subr.bf16.mxu0 %v2328_v38 }
 0x1bf   :  { %2162 = vmatpush3.bf16.msra.mxu1 %v2330_v40 }
 0x1c0   :  { %2150 = vmatpush3.bf16.msra.mxu0 %v2328_v38 }
 0x1c1   :  { %2132 = vmatmul.mubr.bf16.gmra.mrb[12].mxu1 %v2726_v41  ;;  %v2331_v41 = vld [vmem:[#allocation7 + $0x150] sm:$0xff]   ;;  %2183 = vmatprep.subr.bf16.mxu0 %v2337_v25 }
 0x1c2   :  { %2163 = vmatprep.subr.bf16.mxu1 %v2331_v41 }
 0x1c3   :  { %2164 = vmatpush3.bf16.msra.mxu1 %v2331_v41 }
 0x1c4   :  { %2165 = vmatprep.subr.bf16.mxu1 %v2332_v42 }
 0x1c7   :  { %2166 = vmatpush3.bf16.msra.mxu1 %v2332_v42 }
 0x1c8   :  { %2167 = vmatprep.subr.bf16.mxu1 %v2333_v43 }
 0x1cb   :  { %2168 = vmatpush3.bf16.msra.mxu1 %v2333_v43 }
 0x1cc   :  { %2169 = vmatprep.subr.bf16.mxu1 %v2334_v44 }
 0x1cf   :  { %2170 = vmatpush3.bf16.msra.mxu1 %v2334_v44 }
 0x1d0   :  { %2171 = vmatprep.subr.bf16.mxu1 %v2335_v24 }
 0x1d3   :  { %2172 = vmatpush3.bf16.msra.mxu1 %v2335_v24 }
 0x1d4   :  { %2173 = vmatprep.subr.bf16.mxu1 %v2336_v62 }
 0x1d7   :  { %2174 = vmatpush3.bf16.msra.mxu1 %v2336_v62 }
 0x26c   :  { %v2747_v45 = vpop.f32.mrb[0].mxu1 }
 0x26d   :  { %v2749_v46 = vpop.f32.mrb[1].mxu1 }
 0x26e   :  { %v2751_v47 = vpop.f32.mrb[2].mxu1 }
 0x26f   :  { %v2753_v48 = vpop.f32.mrb[3].mxu1 }
 0x274   :  { %v2755_v49 = vpop.f32.mrb[4].mxu1 }
 0x275   :  { %v2757_v50 = vpop.f32.mrb[5].mxu1 }
 0x276   :  { %v2759_v51 = vpop.f32.mrb[6].mxu1 }
 0x277   :  { %v2761_v53 = vpop.f32.mrb[7].mxu1 }
 0x28c   :  { %v2129_v0 = vpop.f32.mrb[8].mxu1 }
 0x28d   :  { %v751_v1 = vadd.f32 %v2129_v0, %v1869_v54  ;;  %v742_v2 = vpop.f32.mrb[9].mxu1 }
 0x28e   :  { %v743_v3 = vadd.f32 %v1869_v54, %v742_v2  ;;  %v2130_v4 = vpop.f32.mrb[10].mxu1 }
 0x28f   :  { %v754_v5 = vadd.f32 %v2130_v4, %v1869_v54  ;;  %v745_v6 = vpop.f32.mrb[11].mxu1  ;;  %v775_v8 = vmax.f32 %v751_v1, 0.0 }
 0x290   :  { %v746_v7 = vadd.f32 %v1869_v54, %v745_v6  ;;  %v773_v10 = vmax.f32 %v743_v3, 0.0 }
 0x291   :  { %v776_v9 = vmax.f32 %v754_v5, 0.0 }
 0x292   :  { %v774_v11 = vmax.f32 %v746_v7, 0.0 }
 0x293   :  { %v782_v12 = vpack.c.bf16 %v776_v9, %v775_v8 }
 0x294   :  { %v781_v13 = vpack.c.bf16 %v774_v11, %v773_v10  ;;  %v2133_v14 = vpop.f32.mrb[12].mxu1  ;;  %v2343_v11 = vld [vmem:[#allocation7 + $0x1b0] sm:$0xff]  }
 0x295   :  { %v767_v15 = vadd.f32 %v2133_v14, %v1869_v54  ;;  %v758_v16 = vpop.f32.mrb[13].mxu1 }
 0x296   :  { %v759_v61 = vadd.f32 %v1869_v54, %v758_v16  ;;  %v2134_v17 = vpop.f32.mrb[14].mxu1  ;;  %2151 = vmatprep.mubr.bf16.mxu0 %v781_v13  ;;  %v1887_v13 = vld [vmem:[#allocation8 + $0x6] ss:$0 sm:$0xff] }
 0x297   :  { %v770_v55 = vadd.f32 %v2134_v17, %v1869_v54  ;;  %v761_v18 = vpop.f32.mrb[15].mxu1  ;;  %2152 = vmatmul.mubr.bf16.vlgmr.msra.gmra.mrb[16].mxu0 %v782_v12  ;;  %v779_v19 = vmax.f32 %v767_v15, 0.0  ;;  %v2344_v12 = vld [vmem:[#allocation7 + $0x1b8] sm:$0xff]  }
 0x298   :  { %v762_v56 = vadd.f32 %v1869_v54, %v761_v18  ;;  %v777_v21 = vmax.f32 %v759_v61, 0.0  ;;  %2184 = vmatpush3.bf16.msra.mxu0 %v2337_v25 }
 0x299   :  { %v780_v57 = vmax.f32 %v770_v55, 0.0  ;;  %2185 = vmatprep.subr.bf16.mxu0 %v2338_v63 }
 0x29a   :  { %v778_v58 = vmax.f32 %v762_v56, 0.0 }
 0x29b   :  { %v784_v23 = vpack.c.bf16 %v780_v57, %v779_v19 }
 0x29c   :  { %v783_v60 = vpack.c.bf16 %v778_v58, %v777_v21  ;;  %2186 = vmatpush3.bf16.msra.mxu0 %v2338_v63 }
 0x29d   :  { %2187 = vmatprep.subr.bf16.mxu0 %v2339_v26 }
 0x29e   :  { %2155 = vmatprep.mubr.bf16.mxu0 %v783_v60 }
 0x29f   :  { %2156 = vmatmul.mubr.bf16.gmra.mrb[20].mxu0 %v784_v23 }
 0x2a0   :  { %2188 = vmatpush3.bf16.msra.mxu0 %v2339_v26 }
 0x2a1   :  { %2189 = vmatprep.subr.bf16.mxu0 %v2340_v27 }
 0x2a4   :  { %2190 = vmatpush3.bf16.msra.mxu0 %v2340_v27 }
 0x2a5   :  { %2191 = vmatprep.subr.bf16.mxu0 %v2341_v28 }
 0x2a8   :  { %2192 = vmatpush3.bf16.msra.mxu0 %v2341_v28 }
 0x2a9   :  { %2193 = vmatprep.subr.bf16.mxu0 %v2342_v29 }
 0x2ac   :  { %2194 = vmatpush3.bf16.msra.mxu0 %v2342_v29 }
 0x2ad   :  { %2195 = vmatprep.subr.bf16.mxu0 %v2343_v11 }
 0x2b0   :  { %2196 = vmatpush3.bf16.msra.mxu0 %v2343_v11 }
 0x2b1   :  { %2197 = vmatprep.subr.bf16.mxu0 %v2344_v12 }
 0x2b4   :  { %2198 = vmatpush3.bf16.msra.mxu0 %v2344_v12 }
 0x36a   :  { %v2153_v31 = vpop.f32.mrb[16].mxu0 }
 0x36b   :  { %v898_v32 = vadd.f32 %v2153_v31, %v1878_v30  ;;  %v889_v22 = vpop.f32.mrb[17].mxu0 }
 0x36c   :  { %v890_v33 = vadd.f32 %v1878_v30, %v889_v22  ;;  %v2154_v34 = vpop.f32.mrb[18].mxu0 }
 0x36d   :  { %v901_v35 = vadd.f32 %v2154_v34, %v1878_v30  ;;  %v892_v36 = vpop.f32.mrb[19].mxu0  ;;  %v922_v20 = vmax.f32 %v898_v32, 0.0 }
 0x36e   :  { %v893_v37 = vadd.f32 %v1878_v30, %v892_v36  ;;  %v920_v39 = vmax.f32 %v890_v33, 0.0 }
 0x36f   :  { %v923_v38 = vmax.f32 %v901_v35, 0.0  ;;  %v1896_v35 = vld [vmem:[#allocation8 + $0x7] ss:$0 sm:$0xff] }
 0x370   :  { %v921_v40 = vmax.f32 %v893_v37, 0.0 }
 0x371   :  { %v929_v41 = vpack.c.bf16 %v923_v38, %v922_v20 }
 0x372   :  { %v928_v42 = vpack.c.bf16 %v921_v40, %v920_v39  ;;  %v2157_v43 = vpop.f32.mrb[20].mxu0 }
 0x373   :  { %v914_v44 = vadd.f32 %v2157_v43, %v1878_v30  ;;  %v905_v54 = vpop.f32.mrb[21].mxu0 }
 0x374   :  { %v906_v0 = vadd.f32 %v1878_v30, %v905_v54  ;;  %v2158_v1 = vpop.f32.mrb[22].mxu0  ;;  %2175 = vmatprep.mubr.bf16.mxu1 %v928_v42 }
 0x375   :  { %v917_v2 = vadd.f32 %v2158_v1, %v1878_v30  ;;  %v908_v3 = vpop.f32.mrb[23].mxu0  ;;  %2176 = vmatmul.mubr.bf16.vlgmr.msra.gmra.mrb[16].mxu1 %v929_v41  ;;  %v926_v5 = vmax.f32 %v914_v44, 0.0 }
 0x376   :  { %v909_v4 = vadd.f32 %v1878_v30, %v908_v3  ;;  %v924_v7 = vmax.f32 %v906_v0, 0.0 }
 0x377   :  { %v927_v6 = vmax.f32 %v917_v2, 0.0 }
 0x378   :  { %v925_v8 = vmax.f32 %v909_v4, 0.0 }
 0x379   :  { %v931_v9 = vpack.c.bf16 %v927_v6, %v926_v5 }
 0x37a   :  { %v930_v10 = vpack.c.bf16 %v925_v8, %v924_v7 }
 0x37c   :  { %2179 = vmatprep.mubr.bf16.mxu1 %v930_v10 }
 0x37d   :  { %2180 = vmatmul.mubr.bf16.gmra.mrb[20].mxu1 %v931_v9 }
 0x448   :  { %v2177_v14 = vpop.f32.mrb[16].mxu1 }
 0x449   :  { %v1045_v15 = vadd.f32 %v2177_v14, %v1887_v13  ;;  %v1036_v16 = vpop.f32.mrb[17].mxu1 }
 0x44a   :  { %v1037_v61 = vadd.f32 %v1887_v13, %v1036_v16  ;;  %v2178_v17 = vpop.f32.mrb[18].mxu1 }
 0x44b   :  { %v1048_v55 = vadd.f32 %v2178_v17, %v1887_v13  ;;  %v1039_v18 = vpop.f32.mrb[19].mxu1  ;;  %v1069_v19 = vmax.f32 %v1045_v15, 0.0 }
 0x44c   :  { %v1040_v56 = vadd.f32 %v1887_v13, %v1039_v18  ;;  %v1067_v21 = vmax.f32 %v1037_v61, 0.0 }
 0x44d   :  { %v1070_v57 = vmax.f32 %v1048_v55, 0.0 }
 0x44e   :  { %v1068_v58 = vmax.f32 %v1040_v56, 0.0 }
 0x44f   :  { %v1076_v23 = vpack.c.bf16 %v1070_v57, %v1069_v19  ;;  %v1847_v57 = vld [vmem:[#allocation8 + $0x2] ss:$0 sm:$0xff] }
 0x450   :  { %v1075_v60 = vpack.c.bf16 %v1068_v58, %v1067_v21  ;;  %v2181_v24 = vpop.f32.mrb[20].mxu1  ;;  %v1271_v58 = vand.u32 127, %v288_v52 }
 0x451   :  { %v1061_v62 = vadd.f32 %v2181_v24, %v1887_v13  ;;  %v1052_v25 = vpop.f32.mrb[21].mxu1 }
 0x452   :  { %v1053_v63 = vadd.f32 %v1887_v13, %v1052_v25  ;;  %v2182_v26 = vpop.f32.mrb[22].mxu1  ;;  %2199 = vmatprep.mubr.bf16.mxu0 %v1075_v60  ;;  %v437_v25 = vadd.f32 %v2747_v45, %v1847_v57  ;;  %vm1272_vm0 = vcmp.lt.s32.totalorder %v1271_v58, 16 }
 0x453   :  { %v1064_v27 = vadd.f32 %v2182_v26, %v1887_v13  ;;  %v1055_v28 = vpop.f32.mrb[23].mxu1  ;;  %2200 = vmatmul.mubr.bf16.vlgmr.msra.gmra.mrb[24].mxu0 %v1076_v23  ;;  %v1073_v30 = vmax.f32 %v1061_v62, 0.0 }
 0x454   :  { %v1056_v29 = vadd.f32 %v1887_v13, %v1055_v28  ;;  %v1071_v32 = vmax.f32 %v1053_v63, 0.0 }
 0x455   :  { %v1074_v31 = vmax.f32 %v1064_v27, 0.0  ;;  %v429_v27 = vadd.f32 %v1847_v57, %v2749_v46  ;;  %v453_v46 = vadd.f32 %v2755_v49, %v1847_v57 }
 0x456   :  { %v1072_v22 = vmax.f32 %v1056_v29, 0.0  ;;  %v440_v29 = vadd.f32 %v2751_v47, %v1847_v57 }
 0x457   :  { %v1078_v33 = vpack.c.bf16 %v1074_v31, %v1073_v30  ;;  %v432_v31 = vadd.f32 %v1847_v57, %v2753_v48 }
 0x458   :  { %v1077_v34 = vpack.c.bf16 %v1072_v22, %v1071_v32 }
 0x45a   :  { %2203 = vmatprep.mubr.bf16.mxu0 %v1077_v34 }
 0x45b   :  { %2204 = vmatmul.mubr.bf16.gmra.mrb[28].mxu0 %v1078_v33 }
 0x526   :  { %v2201_v36 = vpop.f32.mrb[24].mxu0 }
 0x527   :  { %v1192_v37 = vadd.f32 %v2201_v36, %v1896_v35  ;;  %v1183_v20 = vpop.f32.mrb[25].mxu0 }
 0x528   :  { %v1184_v38 = vadd.f32 %v1896_v35, %v1183_v20  ;;  %v2202_v39 = vpop.f32.mrb[26].mxu0 }
 0x529   :  { %v1907_v40 = vmul.f32 -1.442695, %v1192_v37  ;;  %v1195_v41 = vadd.f32 %v2202_v39, %v1896_v35  ;;  %v1186_v42 = vpop.f32.mrb[27].mxu0  ;;  %v445_v37 = vadd.f32 %v1847_v57, %v2757_v50 }
 0x52a   :  { %v1905_v43 = vmul.f32 -1.442695, %v1184_v38  ;;  %v1187_v44 = vadd.f32 %v1896_v35, %v1186_v42  ;;  %v456_v38 = vadd.f32 %v2759_v51, %v1847_v57 }
 0x52b   :  { %2363 = vpow2.f32 %v1907_v40  ;;  %v1908_v54 = vmul.f32 -1.442695, %v1195_v41  ;;  %v448_v41 = vadd.f32 %v1847_v57, %v2761_v53  ;;  %v2347_v53 = vld [vmem:[#allocation7 + $0x1d0] sm:$0xff]  }
 0x52c   :  { %2365 = vpow2.f32 %v1905_v43  ;;  %v1906_v0 = vmul.f32 -1.442695, %v1187_v44 }
 0x52d   :  { %2367 = vpow2.f32 %v1908_v54 }
 0x52e   :  { %2369 = vpow2.f32 %v1906_v0  ;;  %v2205_v1 = vpop.f32.mrb[28].mxu0 }
 0x52f   :  { %v1208_v2 = vadd.f32 %v2205_v1, %v1896_v35  ;;  %v1199_v3 = vpop.f32.mrb[29].mxu0  ;;  %v2345_v1 = vld [vmem:[#allocation7 + $0x1c0] sm:$0xff]  }
 0x530   :  { %v1200_v4 = vadd.f32 %v1896_v35, %v1199_v3  ;;  %v2206_v5 = vpop.f32.mrb[30].mxu0  ;;  %2207 = vmatprep.subr.bf16.mxu1 %v2345_v1 }
 0x531   :  { %v1911_v6 = vmul.f32 -1.442695, %v1208_v2  ;;  %v1211_v7 = vadd.f32 %v2206_v5, %v1896_v35  ;;  %v1202_v8 = vpop.f32.mrb[31].mxu0  ;;  %v2346_v2 = vld [vmem:[#allocation7 + $0x1c8] sm:$0xff]   ;;  %2208 = vmatpush3.bf16.msra.mxu1 %v2345_v1 }
 0x532   :  { %v1909_v9 = vmul.f32 -1.442695, %v1200_v4  ;;  %v1203_v10 = vadd.f32 %v1896_v35, %v1202_v8  ;;  %2209 = vmatprep.subr.bf16.mxu1 %v2346_v2 }
 0x533   :  { %2371 = vpow2.f32 %v1911_v6  ;;  %v1912_v11 = vmul.f32 -1.442695, %v1211_v7 }
 0x534   :  { %2373 = vpow2.f32 %v1909_v9  ;;  %v1910_v12 = vmul.f32 -1.442695, %v1203_v10 }
 0x535   :  { %v2364_v13 = vpop.eup %2363  ;;  %2375 = vpow2.f32 %v1912_v11  ;;  %2210 = vmatpush3.bf16.msra.mxu1 %v2346_v2 }
 0x536   :  { %v2366_v14 = vpop.eup %2365  ;;  %v1240_v15 = vadd.f32 1.0, %v2364_v13  ;;  %2377 = vpow2.f32 %v1910_v12  ;;  %2211 = vmatprep.subr.bf16.mxu1 %v2347_v53 }
 0x537   :  { %v2368_v16 = vpop.eup %2367  ;;  %v1238_v61 = vadd.f32 1.0, %v2366_v14 }
 0x538   :  { %v2370_v17 = vpop.eup %2369  ;;  %2379 = vrcp.f32 %v1240_v15  ;;  %v1241_v55 = vadd.f32 1.0, %v2368_v16 }
 0x539   :  { %2381 = vrcp.f32 %v1238_v61  ;;  %v1239_v18 = vadd.f32 1.0, %v2370_v17  ;;  %2212 = vmatpush3.bf16.msra.mxu1 %v2347_v53 }
 0x53a   :  { %2383 = vrcp.f32 %v1241_v55 }
 0x53b   :  { %2385 = vrcp.f32 %v1239_v18 }
 0x53d   :  { %v2372_v56 = vpop.eup %2371 }
 0x53e   :  { %v2374_v19 = vpop.eup %2373  ;;  %v1244_v21 = vadd.f32 1.0, %v2372_v56 }
 0x53f   :  { %v2376_v23 = vpop.eup %2375  ;;  %v1242_v60 = vadd.f32 1.0, %v2374_v19 }
 0x540   :  { %v2378_v24 = vpop.eup %2377  ;;  %2387 = vrcp.f32 %v1244_v21  ;;  %v1245_v62 = vadd.f32 1.0, %v2376_v23 }
 0x541   :  { %2389 = vrcp.f32 %v1242_v60  ;;  %v1243_v63 = vadd.f32 1.0, %v2378_v24 }
 0x542   :  { %v2380_v26 = vpop.eup %2379  ;;  %2391 = vrcp.f32 %v1245_v62 }
 0x543   :  { %v2382_v28 = vpop.eup %2381  ;;  %2393 = vrcp.f32 %v1243_v63  ;;  %v1264_v30 = vmul.f32 %v2380_v26, %v437_v25 }
 0x544   :  { %v2384_v52 = vpop.eup %2383  ;;  %v1262_v32 = vmul.f32 %v2382_v28, %v429_v27  ;;  %v2348_v28 = vld [vmem:[#allocation7 + $0x1d8] sm:$0xff]  }
 0x545   :  { %v2386_v22 = vpop.eup %2385  ;;  %v1275_v33 = vsel %vm1272_vm0, %v1264_v30, -1e+30  ;;  %v1265_v45 = vmul.f32 %v2384_v52, %v440_v29  ;;  %2213 = vmatprep.subr.bf16.mxu1 %v2348_v28  ;;  %v2349_v30 = vld [vmem:[#allocation7 + $0x1e0] sm:$0xff]   ;;  %v2350_v52 = vld [vmem:[#allocation7 + $0x1e8] sm:$0xff]  }
 0x546   :  { %1285 = vmax.xlane.f32.xlu1 %v1275_v33  ;;  %v1273_v34 = vsel %vm1272_vm0, %v1262_v32, -1e+30  ;;  %v1263_v35 = vmul.f32 %v2386_v22, %v432_v31  ;;  %2214 = vmatpush3.bf16.msra.mxu1 %v2348_v28  ;;  %v2351_v31 = vld [vmem:[#allocation7 + $0x1f0] sm:$0xff]   ;;  %v2352_v32 = vld [vmem:[#allocation7 + $0x1f8] sm:$0xff]  }
 0x547   :  { %1281 = vmax.xlane.f32.xlu0 %v1273_v34  ;;  %v1276_v36 = vsel %vm1272_vm0, %v1265_v45, -1e+30  ;;  %2215 = vmatprep.subr.bf16.mxu1 %v2349_v30 }
 0x548   :  { %v1274_v48 = vsel %vm1272_vm0, %v1263_v35, -1e+30 }
 0x54a   :  { %v2388_v47 = vpop.eup %2387  ;;  %1287 = vmax.xlane.f32.xlu1 %v1276_v36  ;;  %2216 = vmatpush3.bf16.msra.mxu1 %v2349_v30 }
 0x54b   :  { %v2390_v20 = vpop.eup %2389  ;;  %1283 = vmax.xlane.f32.xlu0 %v1274_v48  ;;  %v1268_v39 = vmul.f32 %v2388_v47, %v453_v46  ;;  %2217 = vmatprep.subr.bf16.mxu1 %v2350_v52 }
 0x54c   :  { %v2392_v40 = vpop.eup %2391  ;;  %v1266_v42 = vmul.f32 %v2390_v20, %v445_v37 }
 0x54d   :  { %v2394_v43 = vpop.eup %2393  ;;  %v1269_v44 = vmul.f32 %v2392_v40, %v456_v38  ;;  %v1279_v0 = vsel %vm1272_vm0, %v1268_v39, -1e+30 }
 0x54e   :  { %v1277_v49 = vsel %vm1272_vm0, %v1266_v42, -1e+30  ;;  %v1267_v54 = vmul.f32 %v2394_v43, %v448_v41  ;;  %2218 = vmatpush3.bf16.msra.mxu1 %v2350_v52 }
 0x54f   :  { %1289 = vmax.xlane.f32.xlu0 %v1277_v49  ;;  %v1280_v51 = vsel %vm1272_vm0, %v1269_v44, -1e+30  ;;  %2219 = vmatprep.subr.bf16.mxu1 %v2351_v31 }
 0x550   :  { %v1278_v50 = vsel %vm1272_vm0, %v1267_v54, -1e+30 }
 0x551   :  { %1291 = vmax.xlane.f32.xlu1 %v1278_v50 }
 0x552   :  { %2220 = vmatpush3.bf16.msra.mxu1 %v2351_v31 }
 0x553   :  { %1293 = vmax.xlane.f32.xlu0 %v1279_v0  ;;  %2221 = vmatprep.subr.bf16.mxu1 %v2352_v32 }
 0x555   :  { %1295 = vmax.xlane.f32.xlu1 %v1280_v51 }
 0x556   :  { %2222 = vmatpush3.bf16.msra.mxu1 %v2352_v32 }
 0x5d3   :  { %v1286_v3 = vpop.xlane.xlu1 %1285 }
 0x5d4   :  { %v1299_v4 = vsub.f32 %v1275_v33, %v1286_v3  ;;  %v1282_v5 = vpop.xlane.xlu0 %1281 }
 0x5d5   :  { %v1297_v6 = vsub.f32 %v1273_v34, %v1282_v5  ;;  %v2353_v5 = vld [vmem:[#allocation7 + $0x200] sm:$0xff]  }
 0x5d6   :  { %v1309_v9 = vmul.f32 1.442695, %v1299_v4  ;;  %2231 = vmatprep.subr.bf16.mxu0 %v2353_v5  ;;  %2255 = vmatprep.subr.bf16.mxu1 %v2353_v5 }
 0x5d7   :  { %v1305_v7 = vmul.f32 1.442695, %v1297_v6  ;;  %v1288_v8 = vpop.xlane.xlu1 %1287  ;;  %2232 = vmatpush3.bf16.msra.mxu0 %v2353_v5  ;;  %v2354_v6 = vld [vmem:[#allocation7 + $0x208] sm:$0xff]  }
 0x5d8   :  { %v1300_v10 = vsub.f32 %v1276_v36, %v1288_v8  ;;  %v1284_v11 = vpop.xlane.xlu0 %1283  ;;  %2233 = vmatprep.subr.bf16.mxu0 %v2354_v6  ;;  %v2356_v8 = vld [vmem:[#allocation7 + $0x218] sm:$0xff]  }
 0x5d9   :  { %2395 = vpow2.f32 %v1305_v7  ;;  %v1298_v12 = vsub.f32 %v1274_v48, %v1284_v11  ;;  %v2355_v7 = vld [vmem:[#allocation7 + $0x210] sm:$0xff]  }
 0x5da   :  { %2397 = vpow2.f32 %v1309_v9  ;;  %v1311_v14 = vmul.f32 1.442695, %v1300_v10  ;;  %v2357_v9 = vld [vmem:[#allocation7 + $0x220] sm:$0xff]   ;;  %v2358_v10 = vld [vmem:[#allocation7 + $0x228] sm:$0xff]   ;;  %v2359_v11 = vld [vmem:[#allocation7 + $0x230] sm:$0xff]  }
 0x5db   :  { %v1307_v13 = vmul.f32 1.442695, %v1298_v12  ;;  %2234 = vmatpush3.bf16.msra.mxu0 %v2354_v6  ;;  %v2360_v12 = vld [vmem:[#allocation7 + $0x238] sm:$0xff]  }
 0x5dc   :  { %v1290_v15 = vpop.xlane.xlu0 %1289  ;;  %2235 = vmatprep.subr.bf16.mxu0 %v2355_v7 }
 0x5dd   :  { %2399 = vpow2.f32 %v1307_v13  ;;  %v1301_v16 = vsub.f32 %v1277_v49, %v1290_v15 }
 0x5de   :  { %v1292_v61 = vpop.xlane.xlu1 %1291  ;;  %2401 = vpow2.f32 %v1311_v14 }
 0x5df   :  { %v1313_v17 = vmul.f32 1.442695, %v1301_v16  ;;  %v1302_v55 = vsub.f32 %v1278_v50, %v1292_v61  ;;  %2236 = vmatpush3.bf16.msra.mxu0 %v2355_v7 }
 0x5e0   :  { %v1294_v18 = vpop.xlane.xlu0 %1293  ;;  %2237 = vmatprep.subr.bf16.mxu0 %v2356_v8 }
 0x5e1   :  { %2403 = vpow2.f32 %v1313_v17  ;;  %v1315_v56 = vmul.f32 1.442695, %v1302_v55  ;;  %v1303_v19 = vsub.f32 %v1279_v0, %v1294_v18 }
 0x5e2   :  { %v1296_v57 = vpop.xlane.xlu1 %1295 }
 0x5e3   :  { %v2396_v21 = vpop.eup %2395  ;;  %v1317_v58 = vmul.f32 1.442695, %v1303_v19  ;;  %v1304_v23 = vsub.f32 %v1280_v51, %v1296_v57  ;;  %2405 = vpow2.f32 %v1315_v56  ;;  %2238 = vmatpush3.bf16.msra.mxu0 %v2356_v8 }
 0x5e4   :  { %1321 = vadd.xlane.f32.xlu0 %v2396_v21  ;;  %v2398_v24 = vpop.eup %2397  ;;  %2239 = vmatprep.subr.bf16.mxu0 %v2357_v9 }
 0x5e5   :  { %2407 = vpow2.f32 %v1317_v58  ;;  %v1319_v60 = vmul.f32 1.442695, %v1304_v23 }
 0x5e7   :  { %v2400_v62 = vpop.eup %2399  ;;  %2409 = vpow2.f32 %v1319_v60  ;;  %2240 = vmatpush3.bf16.msra.mxu0 %v2357_v9 }
 0x5e8   :  { %1325 = vadd.xlane.f32.xlu0 %v2398_v24  ;;  %1323 = vadd.xlane.f32.xlu1 %v2400_v62  ;;  %v2402_v25 = vpop.eup %2401 }
 0x5e9   :  { %2241 = vmatprep.subr.bf16.mxu0 %v2358_v10 }
 0x5eb   :  { %v2404_v63 = vpop.eup %2403  ;;  %2242 = vmatpush3.bf16.msra.mxu0 %v2358_v10 }
 0x5ec   :  { %1327 = vadd.xlane.f32.xlu1 %v2402_v25  ;;  %1329 = vadd.xlane.f32.xlu0 %v2404_v63 }
 0x5ed   :  { %v2406_v26 = vpop.eup %2405  ;;  %2243 = vmatprep.subr.bf16.mxu0 %v2359_v11 }
 0x5ef   :  { %v2408_v27 = vpop.eup %2407  ;;  %2244 = vmatpush3.bf16.msra.mxu0 %v2359_v11 }
 0x5f0   :  { %1331 = vadd.xlane.f32.xlu1 %v2406_v26  ;;  %1333 = vadd.xlane.f32.xlu0 %v2408_v27 }
 0x5f1   :  { %v2410_v29 = vpop.eup %2409  ;;  %2245 = vmatprep.subr.bf16.mxu0 %v2360_v12 }
 0x5f3   :  { %2246 = vmatpush3.bf16.msra.mxu0 %v2360_v12 }
 0x5f4   :  { %1335 = vadd.xlane.f32.xlu1 %v2410_v29 }
 0x671   :  { %v1322_v22 = vpop.xlane.xlu0 %1321 }
 0x672   :  { %2411 = vrcp.f32 %v1322_v22 }
 0x675   :  { %v1324_v33 = vpop.xlane.xlu1 %1323  ;;  %v1326_v45 = vpop.xlane.xlu0 %1325 }
 0x676   :  { %2413 = vrcp.f32 %v1324_v33 }
 0x677   :  { %2415 = vrcp.f32 %v1326_v45 }
 0x679   :  { %v1328_v34 = vpop.xlane.xlu1 %1327  ;;  %v1330_v35 = vpop.xlane.xlu0 %1329 }
 0x67a   :  { %2417 = vrcp.f32 %v1328_v34 }
 0x67b   :  { %2419 = vrcp.f32 %v1330_v35 }
 0x67c   :  { %v2412_v46 = vpop.eup %2411 }
 0x67d   :  { %v1332_v36 = vpop.xlane.xlu1 %1331  ;;  %v1334_v47 = vpop.xlane.xlu0 %1333  ;;  %v1345_v37 = vmul.f32 %v2412_v46, %v2396_v21 }
 0x67e   :  { %2421 = vrcp.f32 %v1332_v36 }
 0x67f   :  { %2423 = vrcp.f32 %v1334_v47  ;;  %1353 = vst [vmem:[#allocation11] sm:$0xff] %v1345_v37 }
 0x680   :  { %v2414_v48 = vpop.eup %2413 }
 0x681   :  { %v2416_v20 = vpop.eup %2415  ;;  %v1336_v38 = vpop.xlane.xlu1 %1335  ;;  %v1346_v39 = vmul.f32 %v2414_v48, %v2400_v62 }
 0x682   :  { %v1347_v40 = vmul.f32 %v2416_v20, %v2398_v24  ;;  %2425 = vrcp.f32 %v1336_v38 }
 0x683   :  { %1354 = vst [vmem:[#allocation11 + $0x8] sm:$0xff] %v1346_v39  ;;  %v1361_v41 = vpack.c.bf16 %v1346_v39, %v1345_v37 }
 0x684   :  { %v2418_v42 = vpop.eup %2417  ;;  %1355 = vst [vmem:[#allocation11 + $0x10] sm:$0xff] %v1347_v40 }
 0x685   :  { %v2420_v43 = vpop.eup %2419  ;;  %v1348_v44 = vmul.f32 %v2418_v42, %v2402_v25  ;;  %2223 = vmatprep.mubr.bf16.mxu1 %v1361_v41 }
 0x686   :  { %v1349_v49 = vmul.f32 %v2420_v43, %v2404_v63 }
 0x687   :  { %1356 = vst [vmem:[#allocation11 + $0x18] sm:$0xff] %v1348_v44  ;;  %v1362_v54 = vpack.c.bf16 %v1348_v44, %v1347_v40 }
 0x688   :  { %v2422_v50 = vpop.eup %2421  ;;  %1357 = vst [vmem:[#allocation11 + $0x20] sm:$0xff] %v1349_v49 }
 0x689   :  { %v2424_v0 = vpop.eup %2423  ;;  %2224 = vmatmul.mubr.bf16.vlgmr.msra.gmra.mrb[24].mxu1 %v1362_v54  ;;  %v1350_v51 = vmul.f32 %v2422_v50, %v2406_v26 }
 0x68a   :  { %v1351_v1 = vmul.f32 %v2424_v0, %v2408_v27  ;;  %2263 = vmatpush3.bf16.msra.mxu1 %v2353_v5 }
 0x68b   :  { %1358 = vst [vmem:[#allocation11 + $0x28] sm:$0xff] %v1350_v51  ;;  %v1363_v2 = vpack.c.bf16 %v1350_v51, %v1349_v49  ;;  %2256 = vmatprep.subr.bf16.mxu1 %v2354_v6 }
 0x68c   :  { %v2426_v53 = vpop.eup %2425  ;;  %1359 = vst [vmem:[#allocation11 + $0x30] sm:$0xff] %v1351_v1 }
 0x68d   :  { %2227 = vmatprep.mubr.bf16.mxu1 %v1363_v2  ;;  %v1352_v3 = vmul.f32 %v2426_v53, %v2410_v29 }
 0x68e   :  { %2264 = vmatpush3.bf16.msra.mxu1 %v2354_v6 }
 0x68f   :  { %1360 = vst [vmem:[#allocation11 + $0x38] sm:$0xff] %v1352_v3  ;;  %v1364_v4 = vpack.c.bf16 %v1352_v3, %v1351_v1  ;;  %2257 = vmatprep.subr.bf16.mxu1 %v2355_v7  ;;  %v1495_v3 = vld [vmem:[#allocation8 + $0x8] sm:$0x1] }
 0x691   :  { %2228 = vmatmul.mubr.bf16.gmra.mrb[28].mxu1 %v1364_v4 }
 0x692   :  { %2265 = vmatpush3.bf16.msra.mxu1 %v2355_v7  ;;  %v1921_v7 = vld [vmem:[#allocation8 + $0x9] ss:$0 sm:$0xff] }
 0x693   :  { %2258 = vmatprep.subr.bf16.mxu1 %v2356_v8 }
 0x696   :  { %2266 = vmatpush3.bf16.msra.mxu1 %v2356_v8 }
 0x697   :  { %2259 = vmatprep.subr.bf16.mxu1 %v2357_v9 }
 0x69a   :  { %2267 = vmatpush3.bf16.msra.mxu1 %v2357_v9 }
 0x69b   :  { %2260 = vmatprep.subr.bf16.mxu1 %v2358_v10 }
 0x69e   :  { %2268 = vmatpush3.bf16.msra.mxu1 %v2358_v10 }
 0x69f   :  { %2261 = vmatprep.subr.bf16.mxu1 %v2359_v11 }
 0x6a2   :  { %2269 = vmatpush3.bf16.msra.mxu1 %v2359_v11 }
 0x6a3   :  { %2262 = vmatprep.subr.bf16.mxu1 %v2360_v12 }
 0x6a6   :  { %2270 = vmatpush3.bf16.msra.mxu1 %v2360_v12 }
 0x75c   :  { %v2225_v13 = vpop.f32.mrb[24].mxu1 }
 0x75d   :  { %v1464_v14 = vpop.f32.mrb[25].mxu1 }
 0x75e   :  { %v2226_v15 = vpop.f32.mrb[26].mxu1 }
 0x75f   :  { %v1467_v16 = vpop.f32.mrb[27].mxu1 }
 0x760   :  { %v1497_v61 = vadd.f32 %v1467_v16, %v1464_v14 }
 0x762   :  { %v1498_v17 = vadd.f32 %v2225_v13, %v1497_v61 }
 0x764   :  { %v2229_v55 = vpop.f32.mrb[28].mxu1  ;;  %v1499_v18 = vadd.f32 %v2226_v15, %v1498_v17 }
 0x765   :  { %v1480_v56 = vpop.f32.mrb[29].mxu1 }
 0x766   :  { %v1500_v19 = vadd.f32 %v1499_v18, %v1480_v56  ;;  %v2230_v57 = vpop.f32.mrb[30].mxu1 }
 0x767   :  { %v1483_v21 = vpop.f32.mrb[31].mxu1 }
 0x768   :  { %v1501_v58 = vadd.f32 %v1500_v19, %v1483_v21 }
 0x76a   :  { %v1502_v23 = vadd.f32 %v2229_v55, %v1501_v58 }
 0x76c   :  { %v1503_v60 = vadd.f32 %v2230_v57, %v1502_v23 }
 0x76e   :  { %v1504_v24 = vrot.slane %v1503_v60, 4 }
 0x770   :  { %v1505_v62 = vadd.f32 %v1504_v24, %v1503_v60 }
 0x772   :  { %v1506_v25 = vrot.slane %v1505_v62, 2 }
 0x774   :  { %v1507_v63 = vadd.f32 %v1506_v25, %v1505_v62 }
 0x776   :  { %v1508_v26 = vrot.slane %v1507_v63, 1 }
 0x778   :  { %v1509_v27 = vadd.f32 %v1508_v26, %v1507_v63 }
 0x77a   :  { %v1510_v28 = vmul.f32 0.015625, %v1509_v27 }
 0x77c   :  { %v1511_v29 = vsub.f32 %v1464_v14, %v1510_v28  ;;  %v1512_v30 = vsub.f32 %v1467_v16, %v1510_v28  ;;  %v1513_v52 = vsub.f32 %v2225_v13, %v1510_v28  ;;  %v1514_v31 = vsub.f32 %v2226_v15, %v1510_v28 }
 0x77d   :  { %v1515_v32 = vsub.f32 %v1480_v56, %v1510_v28  ;;  %v1516_v22 = vsub.f32 %v1483_v21, %v1510_v28  ;;  %v1517_v33 = vsub.f32 %v2229_v55, %v1510_v28  ;;  %v1518_v45 = vsub.f32 %v2230_v57, %v1510_v28 }
 0x77e   :  { %v1519_v34 = vmul.f32 %v1511_v29, %v1511_v29  ;;  %v1520_v35 = vmul.f32 %v1512_v30, %v1512_v30  ;;  %v1521_v46 = vmul.f32 %v1513_v52, %v1513_v52  ;;  %v1522_v47 = vmul.f32 %v1514_v31, %v1514_v31 }
 0x77f   :  { %v1523_v48 = vmul.f32 %v1515_v32, %v1515_v32  ;;  %v1524_v38 = vmul.f32 %v1516_v22, %v1516_v22  ;;  %v1525_v40 = vmul.f32 %v1517_v33, %v1517_v33  ;;  %v1526_v42 = vmul.f32 %v1518_v45, %v1518_v45 }
 0x780   :  { %v1527_v36 = vadd.f32 %v1520_v35, %v1519_v34 }
 0x782   :  { %v1528_v37 = vadd.f32 %v1527_v36, %v1521_v46 }
 0x784   :  { %v1529_v20 = vadd.f32 %v1528_v37, %v1522_v47 }
 0x786   :  { %v1530_v39 = vadd.f32 %v1529_v20, %v1523_v48 }
 0x788   :  { %v1531_v41 = vadd.f32 %v1530_v39, %v1524_v38 }
 0x78a   :  { %v1532_v43 = vadd.f32 %v1531_v41, %v1525_v40 }
 0x78c   :  { %v1533_v44 = vadd.f32 %v1532_v43, %v1526_v42 }
 0x78e   :  { %v1534_v49 = vrot.slane %v1533_v44, 4 }
 0x790   :  { %v1535_v54 = vadd.f32 %v1534_v49, %v1533_v44 }
 0x792   :  { %v1536_v50 = vrot.slane %v1535_v54, 2 }
 0x794   :  { %v1537_v0 = vadd.f32 %v1536_v50, %v1535_v54 }
 0x796   :  { %v1538_v51 = vrot.slane %v1537_v0, 1 }
 0x798   :  { %v1539_v1 = vadd.f32 %v1538_v51, %v1537_v0 }
 0x79a   :  { %v1540_v2 = vmul.f32 0.015625, %v1539_v1 }
 0x79c   :  { %v1541_v53 = vadd.f32 1e-05, %v1540_v2 }
 0x79e   :  { %2427 = vrsqrt.f32 %v1541_v53 }
 0x7a8   :  { %v2428_v4 = vpop.eup %2427 }
 0x7a9   :  { %v1543_v5 = vmul.f32 %v2428_v4, %v1495_v3 }
 0x7ab   :  { %v1547_v6 = vrot.slane %v1543_v5, %v2731_v59 }
 0x7ad   :  { %v1551_v8 = vmul.f32 %v1547_v6, %v1514_v31  ;;  %v1553_v9 = vmul.f32 %v1547_v6, %v1516_v22  ;;  %v1554_v10 = vmul.f32 %v1547_v6, %v1517_v33  ;;  %v1555_v11 = vmul.f32 %v1547_v6, %v1518_v45 }
 0x7ae   :  { %v1548_v12 = vmul.f32 %v1547_v6, %v1511_v29  ;;  %v1549_v13 = vmul.f32 %v1547_v6, %v1512_v30  ;;  %v1552_v14 = vmul.f32 %v1547_v6, %v1515_v32  ;;  %v1550_v15 = vmul.f32 %v1547_v6, %v1513_v52 }
 0x7af   :  { %v1565_v16 = vadd.f32 %v1921_v7, %v1553_v9  ;;  %v1563_v61 = vadd.f32 %v1921_v7, %v1551_v8  ;;  %v1566_v17 = vadd.f32 %v1921_v7, %v1554_v10  ;;  %v1567_v55 = vadd.f32 %v1921_v7, %v1555_v11 }
 0x7b0   :  { %v1560_v18 = vadd.f32 %v1921_v7, %v1548_v12  ;;  %v1561_v56 = vadd.f32 %v1921_v7, %v1549_v13  ;;  %v1564_v19 = vadd.f32 %v1921_v7, %v1552_v14  ;;  %v1562_v57 = vadd.f32 %v1921_v7, %v1550_v15 }
 0x7b1   :  { %v1573_v21 = vmax.f32 %v1565_v16, 0.0  ;;  %v1571_v58 = vmax.f32 %v1563_v61, 0.0  ;;  %v1574_v23 = vmax.f32 %v1566_v17, 0.0  ;;  %v1575_v60 = vmax.f32 %v1567_v55, 0.0 }
 0x7b2   :  { %v1568_v24 = vmax.f32 %v1560_v18, 0.0  ;;  %v1569_v62 = vmax.f32 %v1561_v56, 0.0  ;;  %v1572_v25 = vmax.f32 %v1564_v19, 0.0  ;;  %v1570_v63 = vmax.f32 %v1562_v57, 0.0 }
 0x7b3   :  { %v1579_v26 = vpack.c.bf16 %v1575_v60, %v1574_v23 }
 0x7b4   :  { %v1576_v27 = vpack.c.bf16 %v1569_v62, %v1568_v24  ;;  %v1578_v28 = vpack.c.bf16 %v1573_v21, %v1572_v25  ;;  %v1577_v29 = vpack.c.bf16 %v1571_v58, %v1570_v63 }
 0x7b6   :  { %2247 = vmatprep.mubr.bf16.mxu0 %v1576_v27  ;;  %2251 = vmatprep.mubr.bf16.mxu1 %v1578_v28 }
 0x7b7   :  { %2248 = vmatmul.mubr.bf16.vlgmr.msra.gmra.mrb[32].mxu0 %v1577_v29  ;;  %2252 = vmatmul.mubr.bf16.vlgmr.msra.gmra.mrb[32].mxu1 %v1579_v26 }
 0x7b8   :  { %2530 = shalt.err (!%p2527_p8)
}
 0x7b9   :  { %s2531_s20 = scalar_lea.hbm %s2817_s5, 1024 }
 0x7ba   :  { %p2532_p9 = scmp.ne.s32.totalorder %s2817_s5, %s2531_s20  ;;  %p2535_p10 = scmp.lt.u32.totalorder %s2531_s20, %s2817_s5 }
 0x7bc   :  { %p2537_p11 = pnand %p2535_p10, %p2532_p9 }
 0x7be   :  { %2540 = shalt.err (!%p2537_p11)
}
 0x7bf   :  { %1822 = dma.vmem_to_hbm [thread:$0]  %s1817_s1, 1024, %s2817_s5, [#allocation12], %s2579_s2, %s2579_s2, %s2580_s30   ;;  %v1710_v23 = vld [vmem:[#allocation8 + $0xa] sm:$0x1]  ;;  %v1930_v25 = vld [vmem:[#allocation8 + $0xb] ss:$0 sm:$0xff] }
 0x7c0   :  { %s2582_s5 = smov [#allocation10]  }
 0x7c1   :  { %s1804_s28 = sshll.u32 %s2582_s5, 4  ;;  %s1805_s28 = int_to_ptr.vmem [resolvable:$true] %s1804_s28 }
 0x7c2   :  { %s2541_s29 = scalar_lea.vmem %s1805_s28, 1024  ;;  %p2546_p13 = scmp.lt.s32.totalorder %s1805_s28, %s1805_s28 }
 0x7c3   :  { %p2542_p12 = scmp.ne.s32.totalorder %s1805_s28, %s2541_s29  ;;  %p2547_p0 = scmp.lt.s32.totalorder %s2541_s29, %s2541_s29 }
 0x7c5   :  { %p2548_p1 = por %p2547_p0, %p2546_p13 }
 0x7c7   :  { %p2549_p2 = pnand %p2548_p1, %p2542_p12 }
 0x88a   :  { %v2249_v30 = vpop.f32.mrb[32].mxu0  ;;  %v2253_v52 = vpop.f32.mrb[32].mxu1 }
 0x88b   :  { %v1679_v31 = vpop.f32.mrb[33].mxu0  ;;  %v1695_v32 = vpop.f32.mrb[33].mxu1 }
 0x88c   :  { %v2250_v22 = vpop.f32.mrb[34].mxu0  ;;  %v2254_v33 = vpop.f32.mrb[34].mxu1 }
 0x88d   :  { %v1682_v45 = vpop.f32.mrb[35].mxu0  ;;  %v1698_v34 = vpop.f32.mrb[35].mxu1 }
 0x88e   :  { %v1712_v35 = vadd.f32 %v1682_v45, %v1679_v31 }
 0x890   :  { %v1713_v46 = vadd.f32 %v2249_v30, %v1712_v35 }
 0x892   :  { %v1714_v36 = vadd.f32 %v2250_v22, %v1713_v46 }
 0x894   :  { %v1715_v47 = vadd.f32 %v1714_v36, %v1695_v32 }
 0x896   :  { %v1716_v37 = vadd.f32 %v1715_v47, %v1698_v34 }
 0x898   :  { %v1717_v48 = vadd.f32 %v2253_v52, %v1716_v37 }
 0x89a   :  { %v1718_v20 = vadd.f32 %v2254_v33, %v1717_v48 }
 0x89c   :  { %v1719_v38 = vrot.slane %v1718_v20, 4 }
 0x89e   :  { %v1720_v39 = vadd.f32 %v1719_v38, %v1718_v20 }
 0x8a0   :  { %v1721_v40 = vrot.slane %v1720_v39, 2 }
 0x8a2   :  { %v1722_v41 = vadd.f32 %v1721_v40, %v1720_v39 }
 0x8a4   :  { %v1723_v42 = vrot.slane %v1722_v41, 1 }
 0x8a6   :  { %v1724_v43 = vadd.f32 %v1723_v42, %v1722_v41 }
 0x8a8   :  { %v1725_v44 = vmul.f32 0.015625, %v1724_v43 }
 0x8aa   :  { %v1726_v49 = vsub.f32 %v1679_v31, %v1725_v44  ;;  %v1727_v54 = vsub.f32 %v1682_v45, %v1725_v44  ;;  %v1728_v50 = vsub.f32 %v2249_v30, %v1725_v44  ;;  %v1729_v0 = vsub.f32 %v2250_v22, %v1725_v44 }
 0x8ab   :  { %v1730_v51 = vsub.f32 %v1695_v32, %v1725_v44  ;;  %v1731_v1 = vsub.f32 %v1698_v34, %v1725_v44  ;;  %v1732_v2 = vsub.f32 %v2253_v52, %v1725_v44  ;;  %v1733_v53 = vsub.f32 %v2254_v33, %v1725_v44 }
 0x8ac   :  { %v1734_v3 = vmul.f32 %v1726_v49, %v1726_v49  ;;  %v1735_v4 = vmul.f32 %v1727_v54, %v1727_v54  ;;  %v1736_v5 = vmul.f32 %v1728_v50, %v1728_v50  ;;  %v1737_v7 = vmul.f32 %v1729_v0, %v1729_v0 }
 0x8ad   :  { %v1738_v9 = vmul.f32 %v1730_v51, %v1730_v51  ;;  %v1739_v11 = vmul.f32 %v1731_v1, %v1731_v1  ;;  %v1740_v13 = vmul.f32 %v1732_v2, %v1732_v2  ;;  %v1741_v15 = vmul.f32 %v1733_v53, %v1733_v53 }
 0x8ae   :  { %v1742_v6 = vadd.f32 %v1735_v4, %v1734_v3 }
 0x8b0   :  { %v1743_v8 = vadd.f32 %v1742_v6, %v1736_v5 }
 0x8b2   :  { %v1744_v10 = vadd.f32 %v1743_v8, %v1737_v7 }
 0x8b4   :  { %v1745_v12 = vadd.f32 %v1744_v10, %v1738_v9 }
 0x8b6   :  { %v1746_v14 = vadd.f32 %v1745_v12, %v1739_v11 }
 0x8b8   :  { %v1747_v16 = vadd.f32 %v1746_v14, %v1740_v13 }
 0x8ba   :  { %v1748_v61 = vadd.f32 %v1747_v16, %v1741_v15 }
 0x8bc   :  { %v1749_v17 = vrot.slane %v1748_v61, 4 }
 0x8be   :  { %v1750_v55 = vadd.f32 %v1749_v17, %v1748_v61 }
 0x8c0   :  { %v1751_v18 = vrot.slane %v1750_v55, 2 }
 0x8c2   :  { %v1752_v56 = vadd.f32 %v1751_v18, %v1750_v55 }
 0x8c4   :  { %v1753_v19 = vrot.slane %v1752_v56, 1 }
 0x8c6   :  { %v1754_v57 = vadd.f32 %v1753_v19, %v1752_v56 }
 0x8c8   :  { %v1755_v21 = vmul.f32 0.015625, %v1754_v57 }
 0x8ca   :  { %v1756_v58 = vadd.f32 1e-05, %v1755_v21 }
 0x8cc   :  { %2429 = vrsqrt.f32 %v1756_v58 }
 0x8d6   :  { %v2430_v60 = vpop.eup %2429 }
 0x8d7   :  { %v1758_v24 = vmul.f32 %v2430_v60, %v1710_v23 }
 0x8d9   :  { %v1762_v62 = vrot.slane %v1758_v24, %v2731_v59 }
 0x8db   :  { %v1763_v63 = vmul.f32 %v1762_v62, %v1726_v49  ;;  %v1764_v26 = vmul.f32 %v1762_v62, %v1727_v54  ;;  %v1765_v27 = vmul.f32 %v1762_v62, %v1728_v50  ;;  %v1766_v28 = vmul.f32 %v1762_v62, %v1729_v0 }
 0x8dc   :  { %v1767_v29 = vmul.f32 %v1762_v62, %v1730_v51  ;;  %v1768_v30 = vmul.f32 %v1762_v62, %v1731_v1  ;;  %v1769_v52 = vmul.f32 %v1762_v62, %v1732_v2  ;;  %v1770_v31 = vmul.f32 %v1762_v62, %v1733_v53 }
 0x8dd   :  { %v1775_v32 = vadd.f32 %v1930_v25, %v1763_v63  ;;  %v1776_v22 = vadd.f32 %v1930_v25, %v1764_v26  ;;  %v1777_v33 = vadd.f32 %v1930_v25, %v1765_v27  ;;  %v1778_v45 = vadd.f32 %v1930_v25, %v1766_v28 }
 0x8de   :  { %v1779_v34 = vadd.f32 %v1930_v25, %v1767_v29  ;;  %v1780_v35 = vadd.f32 %v1930_v25, %v1768_v30  ;;  %v1781_v46 = vadd.f32 %v1930_v25, %v1769_v52  ;;  %v1782_v36 = vadd.f32 %v1930_v25, %v1770_v31 }
 0x8df   :  { %v1783_v59 = vmax.f32 %v1775_v32, 0.0  ;;  %v1784_v47 = vmax.f32 %v1776_v22, 0.0  ;;  %v1785_v37 = vmax.f32 %v1777_v33, 0.0  ;;  %v1786_v48 = vmax.f32 %v1778_v45, 0.0 }
 0x8e0   :  { %v1787_v20 = vmax.f32 %v1779_v34, 0.0  ;;  %v1788_v38 = vmax.f32 %v1780_v35, 0.0  ;;  %v1789_v39 = vmax.f32 %v1781_v46, 0.0  ;;  %v1790_v40 = vmax.f32 %v1782_v36, 0.0 }
 0x8e1   :  { %1791 = vst [vmem:[#allocation10] sm:$0xff] %v1783_v59  ;;  %1792 = vst [vmem:[#allocation10 + $0x8] sm:$0xff] %v1784_v47 }
 0x8e2   :  { %1793 = vst [vmem:[#allocation10 + $0x10] sm:$0xff] %v1785_v37  ;;  %1794 = vst [vmem:[#allocation10 + $0x18] sm:$0xff] %v1786_v48 }
 0x8e3   :  { %1795 = vst [vmem:[#allocation10 + $0x20] sm:$0xff] %v1787_v20  ;;  %1796 = vst [vmem:[#allocation10 + $0x28] sm:$0xff] %v1788_v38 }
 0x8e4   :  { %1797 = vst [vmem:[#allocation10 + $0x30] sm:$0xff] %v1789_v39  ;;  %1798 = vst [vmem:[#allocation10 + $0x38] sm:$0xff] %v1790_v40 }
 0x8e5   :  { %2552 = shalt.err (!%p2549_p2)
}
 0x8e6   :  { %s2553_s7 = scalar_lea.hbm %s2816_s4, 1024 }
 0x8e7   :  { %p2554_p3 = scmp.ne.s32.totalorder %s2816_s4, %s2553_s7  ;;  %p2557_p4 = scmp.lt.u32.totalorder %s2553_s7, %s2816_s4 }
 0x8e9   :  { %p2559_p5 = pnand %p2557_p4, %p2554_p3 }
 0x8eb   :  { %2562 = shalt.err (!%p2559_p5)
}
 0x8ec   :  { %1810 = dma.vmem_to_hbm [thread:$0]  %s1805_s28, 1024, %s2816_s4, [#allocation4], %s2579_s2, %s2579_s2, %s2580_s30  }
 0x8ed   :  { %2569 = dma.done.wait [#allocation4], 1024  }
 0x8ee   :  { %2570 = vsyncadd [#allocation4], 4294966272 }
 0x8ef   :  { %2571 = dma.done.wait [#allocation12], 1024  }
 0x8f0   :  { %2572 = vsyncadd [#allocation12], 4294966272 }
 0x8f1   :  { %1829 = vsyncpa [#allocation3], 1 }
 0x8f2   :  { %1830 = vsyncpa [#allocation6], 1 }
 0x8f3   :  { %1831 = vsyncpa [#allocation9], 1 }
 0x8f4   :  { %1832 = vsyncpa [#allocation4], 1 }
 0x8f5   :  { %1833 = vsyncpa [#allocation12], 1 }

</bundles_post_ra>
